<compile_context>
chip_gen: v5e
topology: v5e:2x2
jax: 0.10.0
libtpu: 0.0.40
codegen_flags: <defaults>
</compile_context>

<pallas_src>
import functools

import jax
import jax.numpy as jnp
from jax.experimental import pallas as pl
from jax.experimental.pallas import tpu as pltpu


def _round_up(x, m):
    return (x + m - 1) // m * m


# ---------------------------------------------------------------------------
# Pallas kernel: bidirectional LSTM recurrence over precomputed input gates
# + final FC projection. grid = (Tp // TT,), iterated sequentially
# ("arbitrary"); h/c scratch persists across grid steps.
# ---------------------------------------------------------------------------
def _bilstm_kernel(gxf_ref, gxb_ref, whh_ref, wfcf_ref, wfcb_ref, bfc_ref,
                   out_ref,
                   hf, cf, hb, cb,
                   *, hidden_dim, seq_len, padded_len, steps_per_block):
    blk = pl.program_id(0)
    H = hidden_dim
    TT = steps_per_block
    Bp = hf.shape[0]

    @pl.when(blk == 0)
    def _():
        hf[...] = jnp.zeros_like(hf)
        cf[...] = jnp.zeros_like(cf)
        hb[...] = jnp.zeros_like(hb)
        cb[...] = jnp.zeros_like(cb)

    # Hoisted once per grid step: fused recurrent weight [Whh_f | Whh_b], (H, 8H).
    whh = whh_ref[...]
    need_mask = (padded_len != seq_len)  # static Python bool

    def step(lt, carry):
        hf_c, cf_c, hb_c, cb_c = carry
        gxf = gxf_ref[lt]                                # (Bp, 4H) fwd timestep
        gxb = gxb_ref[lt]                                # (Bp, 4H) bwd timestep
        # Single fused MXU op for both directions; quadrant slices are tile-aligned.
        h2 = jnp.concatenate([hf_c, hb_c], axis=0)       # (2Bp, H)
        g2 = jnp.dot(h2, whh, preferred_element_type=jnp.float32)  # (2Bp, 8H)
        gates_f = gxf + g2[:Bp, :4 * H]
        gates_b = gxb + g2[Bp:, 4 * H:]

        def cell(gates, c):
            # PyTorch gate order along 4H: [i, f, g, o]
            i = jax.nn.sigmoid(gates[:, 0:H])
            f = jax.nn.sigmoid(gates[:, H:2 * H])
            g = jnp.tanh(gates[:, 2 * H:3 * H])
            o = jax.nn.sigmoid(gates[:, 3 * H:4 * H])
            c_new = f * c + i * g
            h_new = o * jnp.tanh(c_new)
            return h_new, c_new

        hf_n, cf_n = cell(gates_f, cf_c)
        hb_n, cb_n = cell(gates_b, cb_c)

        if need_mask:  # only compiled when T was padded up to a multiple of TT
            valid = (blk * TT + lt) < seq_len
            hf_n = jnp.where(valid, hf_n, hf_c)
            cf_n = jnp.where(valid, cf_n, cf_c)
            hb_n = jnp.where(valid, hb_n, hb_c)
            cb_n = jnp.where(valid, cb_n, cb_c)
        return hf_n, cf_n, hb_n, cb_n

    carry0 = (hf[...], cf[...], hb[...], cb[...])
    hf_o, cf_o, hb_o, cb_o = jax.lax.fori_loop(0, TT, step, carry0, unroll=True)
    hf[...] = hf_o
    cf[...] = cf_o
    hb[...] = hb_o
    cb[...] = cb_o

    # Output block stays resident across the whole "arbitrary" grid axis; it is
    # intentionally written only on the final grid step.
    @pl.when(blk == pl.num_programs(0) - 1)
    def _():
        out = (jnp.dot(hf_o, wfcf_ref[...], preferred_element_type=jnp.float32)
               + jnp.dot(hb_o, wfcb_ref[...], preferred_element_type=jnp.float32)
               + bfc_ref[...])
        out_ref[...] = out.astype(out_ref.dtype)


def lstm_model_forward(x_ids, params, *, steps_per_block=32):
    """x_ids: int32 (B, T) token ids. Returns (B, output_dim) float32."""
    emb_table = params["embedding"]                       # (V, E), pad row zeroed
    # Embedding gather is glue (data-dependent gather, plain JAX).
    emb = jnp.take(emb_table, x_ids, axis=0)              # (B, T, E)
    emb_t = jnp.transpose(emb, (1, 0, 2)).astype(jnp.float32)  # (T, B, E) time-major

    T, B, E = emb_t.shape
    H = params["whh_f"].shape[0]
    O = params["wfc"].shape[1]

    # ---- Hoisted off the serial critical path: one big matmul per direction ----
    gx_f = jnp.einsum("tbe,eg->tbg", emb_t, params["wih_f"]) + params["b_f"]       # (T,B,4H)
    gx_b = jnp.einsum("tbe,eg->tbg", emb_t[::-1], params["wih_b"]) + params["b_b"]  # (T,B,4H)

    # Pad: batch to a sublane tile, time to a multiple of TT, output to a lane tile.
    TT = max(1, min(steps_per_block, T))
    Tp = _round_up(T, TT)
    Bp = _round_up(B, 8)
    Op = _round_up(O, 128)

    pad_tb = ((0, Tp - T), (0, Bp - B), (0, 0))
    gx_f = jnp.pad(gx_f, pad_tb)
    gx_b = jnp.pad(gx_b, pad_tb)

    whh_cat = jnp.concatenate([params["whh_f"], params["whh_b"]], axis=1)  # (H, 8H)
    wfc_f = jnp.pad(params["wfc"][:H], ((0, 0), (0, Op - O)))              # (H, Op)
    wfc_b = jnp.pad(params["wfc"][H:], ((0, 0), (0, Op - O)))              # (H, Op)
    bfc = jnp.pad(params["bfc"], ((0, 0), (0, Op - O)))                    # (1, Op)

    kernel = functools.partial(_bilstm_kernel, hidden_dim=H, seq_len=T,
                               padded_len=Tp, steps_per_block=TT)

    nblk = Tp // TT
    const = lambda shape: pl.BlockSpec(shape, lambda i, _s=shape: (0,) * len(_s))

    out = pl.pallas_call(
        kernel,
        out_shape=jax.ShapeDtypeStruct((Bp, Op), jnp.float32),
        grid_spec=pltpu.PrefetchScalarGridSpec(
            num_scalar_prefetch=0,
            grid=(nblk,),
            in_specs=[
                pl.BlockSpec((TT, Bp, 4 * H), lambda i: (i, 0, 0)),  # fwd input gates block
                pl.BlockSpec((TT, Bp, 4 * H), lambda i: (i, 0, 0)),  # bwd input gates block
                const((H, 8 * H)),   # [Whh_f | Whh_b]
                const((H, Op)),      # fc weight, forward half
                const((H, Op)),      # fc weight, backward half
                const((1, Op)),      # fc bias
            ],
            out_specs=pl.BlockSpec((Bp, Op), lambda i: (0, 0)),
            scratch_shapes=[pltpu.VMEM((Bp, H), jnp.float32)] * 4,  # hf, cf, hb, cb
        ),
        compiler_params=pltpu.CompilerParams(dimension_semantics=("arbitrary",)),
    )(gx_f, gx_b, whh_cat, wfc_f, wfc_b, bfc)

    return out[:B, :O]


# ---------------------------------------------------------------------------
# Pure-JAX reference (lax.scan) for correctness checking.
# ---------------------------------------------------------------------------
def lstm_model_reference(x_ids, params):
    emb = jnp.take(params["embedding"], x_ids, axis=0)   # (B, T, E)
    H = params["whh_f"].shape[0]

    def make_step(wih, whh, b):
        def step(carry, x):
            h, c = carry
            gates = x @ wih + h @ whh + b
            i = jax.nn.sigmoid(gates[:, 0:H])
            f = jax.nn.sigmoid(gates[:, H:2 * H])
            g = jnp.tanh(gates[:, 2 * H:3 * H])
            o = jax.nn.sigmoid(gates[:, 3 * H:4 * H])
            c_new = f * c + i * g
            h_new = o * jnp.tanh(c_new)
            return (h_new, c_new), None
        return step

    B = x_ids.shape[0]
    init = (jnp.zeros((B, H), jnp.float32), jnp.zeros((B, H), jnp.float32))
    xs_fwd = jnp.transpose(emb, (1, 0, 2))
    xs_bwd = xs_fwd[::-1]
    (hf, _), _ = jax.lax.scan(make_step(params["wih_f"], params["whh_f"], params["b_f"]), init, xs_fwd)
    (hb, _), _ = jax.lax.scan(make_step(params["wih_b"], params["whh_b"], params["b_b"]), init, xs_bwd)
    hcat = jnp.concatenate([hf, hb], axis=1)
    return hcat @ params["wfc"] + params["bfc"]


def init_params(key, vocab_size, embed_dim, hidden_dim, output_dim, pad_idx):
    ks = jax.random.split(key, 11)
    k = 1.0 / jnp.sqrt(hidden_dim)

    emb = jax.random.normal(ks[0], (vocab_size, embed_dim), jnp.float32)
    emb = emb.at[pad_idx].set(0.0)   # padding_idx row is zero

    def u(kk, shape):
        return jax.random.uniform(kk, shape, jnp.float32, -k, k)

    params = {
        "embedding": emb,
        # stored pre-transposed for the kernel: (E, 4H) / (H, 4H)
        "wih_f": u(ks[1], (embed_dim, 4 * hidden_dim)),
        "whh_f": u(ks[2], (hidden_dim, 4 * hidden_dim)),
        "b_f":   u(ks[3], (1, 4 * hidden_dim)) + u(ks[4], (1, 4 * hidden_dim)),   # b_ih + b_hh
        "wih_b": u(ks[5], (embed_dim, 4 * hidden_dim)),
        "whh_b": u(ks[6], (hidden_dim, 4 * hidden_dim)),
        "b_b":   u(ks[7], (1, 4 * hidden_dim)) + u(ks[8], (1, 4 * hidden_dim)),   # b_ih + b_hh
        "wfc":   u(ks[9], (2 * hidden_dim, output_dim)),
        "bfc":   u(ks[10], (1, output_dim)),
    }
    return params


if __name__ == "__main__":
    VOCAB, EMBED, HIDDEN, OUT, PAD = 50, 16, 32, 4, 0
    B, T = 2, 8

    key = jax.random.PRNGKey(0)
    k_param, k_x = jax.random.split(key)
    params = init_params(k_param, VOCAB, EMBED, HIDDEN, OUT, PAD)
    x_ids = jax.random.randint(k_x, (B, T), 0, VOCAB, dtype=jnp.int32)

    out = jax.block_until_ready(lstm_model_forward(x_ids, params))
    ref = jax.block_until_ready(lstm_model_reference(x_ids, params))

    assert out.shape == (B, OUT)
    assert jnp.allclose(out, ref, atol=2e-3, rtol=2e-3), (out, ref)
    print("KERNEL_OK")
</pallas_src>

<mosaic_0001>
module attributes {stable_mosaic.version = 11 : i64} {
  func.func @_bilstm_kernel(%arg0: i32, %arg1: memref<8x8x128xf32, #tpu.memory_space<vmem>>, %arg2: memref<8x8x128xf32, #tpu.memory_space<vmem>>, %arg3: memref<32x256xf32, #tpu.memory_space<vmem>>, %arg4: memref<32x128xf32, #tpu.memory_space<vmem>>, %arg5: memref<32x128xf32, #tpu.memory_space<vmem>>, %arg6: memref<1x128xf32, #tpu.memory_space<vmem>>, %arg7: memref<8x128xf32, #tpu.memory_space<vmem>>, %arg8: memref<8x32xf32, #tpu.memory_space<vmem>>, %arg9: memref<8x32xf32, #tpu.memory_space<vmem>>, %arg10: memref<8x32xf32, #tpu.memory_space<vmem>>, %arg11: memref<8x32xf32, #tpu.memory_space<vmem>>) attributes {dimension_semantics = [#tpu.dimension_semantics<arbitrary>], iteration_bounds = array<i64: 1>, scalar_prefetch = 0 : i64, scratch_operands = 4 : i64, tpu.core_type = #tpu.core_type<tc>, window_params = [{transform_indices = @transform_0, window_bounds = array<i64: 8, 8, 128>}, {transform_indices = @transform_1, window_bounds = array<i64: 8, 8, 128>}, {pipeline_mode = #tpu.pipeline_mode<synchronous>, transform_indices = @transform_2, window_bounds = array<i64: 32, 256>}, {pipeline_mode = #tpu.pipeline_mode<synchronous>, transform_indices = @transform_3, window_bounds = array<i64: 32, 128>}, {pipeline_mode = #tpu.pipeline_mode<synchronous>, transform_indices = @transform_4, window_bounds = array<i64: 32, 128>}, {pipeline_mode = #tpu.pipeline_mode<synchronous>, transform_indices = @transform_5, window_bounds = array<i64: 1, 128>}, {pipeline_mode = #tpu.pipeline_mode<synchronous>, transform_indices = @transform_6, window_bounds = array<i64: 8, 128>}]} {
    %c0_i32 = arith.constant 0 : i32
    %0 = arith.cmpi eq, %arg0, %c0_i32 : i32
    %1 = arith.extui %0 : i1 to i32
    %c0_i32_0 = arith.constant 0 : i32
    %2 = arith.cmpi ne, %1, %c0_i32_0 : i32
    scf.if %2 {
      %cst_108 = arith.constant 0.000000e+00 : f32
      %511 = vector.broadcast %cst_108 : f32 to vector<8x32xf32>
      %c0_109 = arith.constant 0 : index
      %c0_110 = arith.constant 0 : index
      %512 = vector.load %arg8[%c0_109, %c0_110] : memref<8x32xf32, #tpu.memory_space<vmem>>, vector<8x32xf32>
      tpu.vector_store %arg8[%c0_109, %c0_110], %511 {strides = array<i32>} : memref<8x32xf32, #tpu.memory_space<vmem>>, vector<8x32xf32>,
      %cst_111 = arith.constant 0.000000e+00 : f32
      %513 = vector.broadcast %cst_111 : f32 to vector<8x32xf32>
      %c0_112 = arith.constant 0 : index
      %c0_113 = arith.constant 0 : index
      %514 = vector.load %arg9[%c0_112, %c0_113] : memref<8x32xf32, #tpu.memory_space<vmem>>, vector<8x32xf32>
      tpu.vector_store %arg9[%c0_112, %c0_113], %513 {strides = array<i32>} : memref<8x32xf32, #tpu.memory_space<vmem>>, vector<8x32xf32>,
      %cst_114 = arith.constant 0.000000e+00 : f32
      %515 = vector.broadcast %cst_114 : f32 to vector<8x32xf32>
      %c0_115 = arith.constant 0 : index
      %c0_116 = arith.constant 0 : index
      %516 = vector.load %arg10[%c0_115, %c0_116] : memref<8x32xf32, #tpu.memory_space<vmem>>, vector<8x32xf32>
      tpu.vector_store %arg10[%c0_115, %c0_116], %515 {strides = array<i32>} : memref<8x32xf32, #tpu.memory_space<vmem>>, vector<8x32xf32>,
      %cst_117 = arith.constant 0.000000e+00 : f32
      %517 = vector.broadcast %cst_117 : f32 to vector<8x32xf32>
      %c0_118 = arith.constant 0 : index
      %c0_119 = arith.constant 0 : index
      %518 = vector.load %arg11[%c0_118, %c0_119] : memref<8x32xf32, #tpu.memory_space<vmem>>, vector<8x32xf32>
      tpu.vector_store %arg11[%c0_118, %c0_119], %517 {strides = array<i32>} : memref<8x32xf32, #tpu.memory_space<vmem>>, vector<8x32xf32>,
    } else {
    }
    %c0 = arith.constant 0 : index
    %c0_1 = arith.constant 0 : index
    %3 = vector.load %arg3[%c0, %c0_1] : memref<32x256xf32, #tpu.memory_space<vmem>>, vector<32x256xf32>
    %c0_2 = arith.constant 0 : index
    %c0_3 = arith.constant 0 : index
    %4 = vector.load %arg8[%c0_2, %c0_3] : memref<8x32xf32, #tpu.memory_space<vmem>>, vector<8x32xf32>
    %c0_4 = arith.constant 0 : index
    %c0_5 = arith.constant 0 : index
    %5 = vector.load %arg9[%c0_4, %c0_5] : memref<8x32xf32, #tpu.memory_space<vmem>>, vector<8x32xf32>
    %c0_6 = arith.constant 0 : index
    %c0_7 = arith.constant 0 : index
    %6 = vector.load %arg10[%c0_6, %c0_7] : memref<8x32xf32, #tpu.memory_space<vmem>>, vector<8x32xf32>
    %c0_8 = arith.constant 0 : index
    %c0_9 = arith.constant 0 : index
    %7 = vector.load %arg11[%c0_8, %c0_9] : memref<8x32xf32, #tpu.memory_space<vmem>>, vector<8x32xf32>
    %c0_i32_10 = arith.constant 0 : i32
    %8 = arith.index_cast %c0_i32_10 : i32 to index
    %c0_11 = arith.constant 0 : index
    %c0_12 = arith.constant 0 : index
    %9 = vector.load %arg1[%8, %c0_11, %c0_12] : memref<8x8x128xf32, #tpu.memory_space<vmem>>, vector<1x8x128xf32>
    %10 = vector.shape_cast %9 : vector<1x8x128xf32> to vector<8x128xf32>
    %11 = arith.index_cast %c0_i32_10 : i32 to index
    %c0_13 = arith.constant 0 : index
    %c0_14 = arith.constant 0 : index
    %12 = vector.load %arg2[%11, %c0_13, %c0_14] : memref<8x8x128xf32, #tpu.memory_space<vmem>>, vector<1x8x128xf32>
    %13 = vector.shape_cast %12 : vector<1x8x128xf32> to vector<8x128xf32>
    %14 = tpu.concatenate %4, %6 in 0 : vector<8x32xf32>, vector<8x32xf32> -> vector<16x32xf32>
    %cst = arith.constant dense<0.000000e+00> : vector<16x256xf32>
    %15 = tpu.matmul %14, %3, %cst {dimension_numbers = #tpu.dot_dimension_numbers<[1], [0], [0], [1], [0, 0, 1, 1], [], []>} : vector<16x32xf32>, vector<32x256xf32>, vector<16x256xf32> -> vector<16x256xf32>
    %16 = vector.extract_strided_slice %15 {offsets = [0, 0], sizes = [8, 128], strides = [1, 1]} : vector<16x256xf32> to vector<8x128xf32>
    %17 = arith.addf %10, %16 : vector<8x128xf32>
    %18 = vector.extract_strided_slice %15 {offsets = [8, 128], sizes = [8, 128], strides = [1, 1]} : vector<16x256xf32> to vector<8x128xf32>
    %19 = arith.addf %13, %18 : vector<8x128xf32>
    %20 = vector.extract_strided_slice %17 {offsets = [0, 0], sizes = [8, 32], strides = [1, 1]} : vector<8x128xf32> to vector<8x32xf32>
    %21 = arith.negf %20 : vector<8x32xf32>
    %22 = math.exp %21 : vector<8x32xf32>
    %cst_15 = arith.constant 1.000000e+00 : f32
    %23 = vector.broadcast %cst_15 : f32 to vector<8x32xf32>
    %24 = arith.addf %23, %22 : vector<8x32xf32>
    %25 = arith.divf %23, %24 : vector<8x32xf32>
    %26 = vector.extract_strided_slice %17 {offsets = [0, 32], sizes = [8, 32], strides = [1, 1]} : vector<8x128xf32> to vector<8x32xf32>
    %27 = arith.negf %26 : vector<8x32xf32>
    %28 = math.exp %27 : vector<8x32xf32>
    %cst_16 = arith.constant 1.000000e+00 : f32
    %29 = vector.broadcast %cst_16 : f32 to vector<8x32xf32>
    %30 = arith.addf %29, %28 : vector<8x32xf32>
    %31 = arith.divf %29, %30 : vector<8x32xf32>
    %32 = vector.extract_strided_slice %17 {offsets = [0, 64], sizes = [8, 32], strides = [1, 1]} : vector<8x128xf32> to vector<8x32xf32>
    %33 = math.tanh %32 : vector<8x32xf32>
    %34 = vector.extract_strided_slice %17 {offsets = [0, 96], sizes = [8, 32], strides = [1, 1]} : vector<8x128xf32> to vector<8x32xf32>
    %35 = arith.negf %34 : vector<8x32xf32>
    %36 = math.exp %35 : vector<8x32xf32>
    %cst_17 = arith.constant 1.000000e+00 : f32
    %37 = vector.broadcast %cst_17 : f32 to vector<8x32xf32>
    %38 = arith.addf %37, %36 : vector<8x32xf32>
    %39 = arith.divf %37, %38 : vector<8x32xf32>
    %40 = arith.mulf %31, %5 : vector<8x32xf32>
    %41 = arith.mulf %25, %33 : vector<8x32xf32>
    %42 = arith.addf %40, %41 : vector<8x32xf32>
    %43 = math.tanh %42 : vector<8x32xf32>
    %44 = arith.mulf %39, %43 : vector<8x32xf32>
    %45 = vector.extract_strided_slice %19 {offsets = [0, 0], sizes = [8, 32], strides = [1, 1]} : vector<8x128xf32> to vector<8x32xf32>
    %46 = arith.negf %45 : vector<8x32xf32>
    %47 = math.exp %46 : vector<8x32xf32>
    %cst_18 = arith.constant 1.000000e+00 : f32
    %48 = vector.broadcast %cst_18 : f32 to vector<8x32xf32>
    %49 = arith.addf %48, %47 : vector<8x32xf32>
    %50 = arith.divf %48, %49 : vector<8x32xf32>
    %51 = vector.extract_strided_slice %19 {offsets = [0, 32], sizes = [8, 32], strides = [1, 1]} : vector<8x128xf32> to vector<8x32xf32>
    %52 = arith.negf %51 : vector<8x32xf32>
    %53 = math.exp %52 : vector<8x32xf32>
    %cst_19 = arith.constant 1.000000e+00 : f32
    %54 = vector.broadcast %cst_19 : f32 to vector<8x32xf32>
    %55 = arith.addf %54, %53 : vector<8x32xf32>
    %56 = arith.divf %54, %55 : vector<8x32xf32>
    %57 = vector.extract_strided_slice %19 {offsets = [0, 64], sizes = [8, 32], strides = [1, 1]} : vector<8x128xf32> to vector<8x32xf32>
    %58 = math.tanh %57 : vector<8x32xf32>
    %59 = vector.extract_strided_slice %19 {offsets = [0, 96], sizes = [8, 32], strides = [1, 1]} : vector<8x128xf32> to vector<8x32xf32>
    %60 = arith.negf %59 : vector<8x32xf32>
    %61 = math.exp %60 : vector<8x32xf32>
    %cst_20 = arith.constant 1.000000e+00 : f32
    %62 = vector.broadcast %cst_20 : f32 to vector<8x32xf32>
    %63 = arith.addf %62, %61 : vector<8x32xf32>
    %64 = arith.divf %62, %63 : vector<8x32xf32>
    %65 = arith.mulf %56, %7 : vector<8x32xf32>
    %66 = arith.mulf %50, %58 : vector<8x32xf32>
    %67 = arith.addf %65, %66 : vector<8x32xf32>
    %68 = math.tanh %67 : vector<8x32xf32>
    %69 = arith.mulf %64, %68 : vector<8x32xf32>
    %c1_i32 = arith.constant 1 : i32
    %70 = arith.index_cast %c1_i32 : i32 to index
    %c0_21 = arith.constant 0 : index
    %c0_22 = arith.constant 0 : index
    %71 = vector.load %arg1[%70, %c0_21, %c0_22] : memref<8x8x128xf32, #tpu.memory_space<vmem>>, vector<1x8x128xf32>
    %72 = vector.shape_cast %71 : vector<1x8x128xf32> to vector<8x128xf32>
    %73 = arith.index_cast %c1_i32 : i32 to index
    %c0_23 = arith.constant 0 : index
    %c0_24 = arith.constant 0 : index
    %74 = vector.load %arg2[%73, %c0_23, %c0_24] : memref<8x8x128xf32, #tpu.memory_space<vmem>>, vector<1x8x128xf32>
    %75 = vector.shape_cast %74 : vector<1x8x128xf32> to vector<8x128xf32>
    %76 = tpu.concatenate %44, %69 in 0 : vector<8x32xf32>, vector<8x32xf32> -> vector<16x32xf32>
    %cst_25 = arith.constant dense<0.000000e+00> : vector<16x256xf32>
    %77 = tpu.matmul %76, %3, %cst_25 {dimension_numbers = #tpu.dot_dimension_numbers<[1], [0], [0], [1], [0, 0, 1, 1], [], []>} : vector<16x32xf32>, vector<32x256xf32>, vector<16x256xf32> -> vector<16x256xf32>
    %78 = vector.extract_strided_slice %77 {offsets = [0, 0], sizes = [8, 128], strides = [1, 1]} : vector<16x256xf32> to vector<8x128xf32>
    %79 = arith.addf %72, %78 : vector<8x128xf32>
    %80 = vector.extract_strided_slice %77 {offsets = [8, 128], sizes = [8, 128], strides = [1, 1]} : vector<16x256xf32> to vector<8x128xf32>
    %81 = arith.addf %75, %80 : vector<8x128xf32>
    %82 = vector.extract_strided_slice %79 {offsets = [0, 0], sizes = [8, 32], strides = [1, 1]} : vector<8x128xf32> to vector<8x32xf32>
    %83 = arith.negf %82 : vector<8x32xf32>
    %84 = math.exp %83 : vector<8x32xf32>
    %cst_26 = arith.constant 1.000000e+00 : f32
    %85 = vector.broadcast %cst_26 : f32 to vector<8x32xf32>
    %86 = arith.addf %85, %84 : vector<8x32xf32>
    %87 = arith.divf %85, %86 : vector<8x32xf32>
    %88 = vector.extract_strided_slice %79 {offsets = [0, 32], sizes = [8, 32], strides = [1, 1]} : vector<8x128xf32> to vector<8x32xf32>
    %89 = arith.negf %88 : vector<8x32xf32>
    %90 = math.exp %89 : vector<8x32xf32>
    %cst_27 = arith.constant 1.000000e+00 : f32
    %91 = vector.broadcast %cst_27 : f32 to vector<8x32xf32>
    %92 = arith.addf %91, %90 : vector<8x32xf32>
    %93 = arith.divf %91, %92 : vector<8x32xf32>
    %94 = vector.extract_strided_slice %79 {offsets = [0, 64], sizes = [8, 32], strides = [1, 1]} : vector<8x128xf32> to vector<8x32xf32>
    %95 = math.tanh %94 : vector<8x32xf32>
    %96 = vector.extract_strided_slice %79 {offsets = [0, 96], sizes = [8, 32], strides = [1, 1]} : vector<8x128xf32> to vector<8x32xf32>
    %97 = arith.negf %96 : vector<8x32xf32>
    %98 = math.exp %97 : vector<8x32xf32>
    %cst_28 = arith.constant 1.000000e+00 : f32
    %99 = vector.broadcast %cst_28 : f32 to vector<8x32xf32>
    %100 = arith.addf %99, %98 : vector<8x32xf32>
    %101 = arith.divf %99, %100 : vector<8x32xf32>
    %102 = arith.mulf %93, %42 : vector<8x32xf32>
    %103 = arith.mulf %87, %95 : vector<8x32xf32>
    %104 = arith.addf %102, %103 : vector<8x32xf32>
    %105 = math.tanh %104 : vector<8x32xf32>
    %106 = arith.mulf %101, %105 : vector<8x32xf32>
    %107 = vector.extract_strided_slice %81 {offsets = [0, 0], sizes = [8, 32], strides = [1, 1]} : vector<8x128xf32> to vector<8x32xf32>
    %108 = arith.negf %107 : vector<8x32xf32>
    %109 = math.exp %108 : vector<8x32xf32>
    %cst_29 = arith.constant 1.000000e+00 : f32
    %110 = vector.broadcast %cst_29 : f32 to vector<8x32xf32>
    %111 = arith.addf %110, %109 : vector<8x32xf32>
    %112 = arith.divf %110, %111 : vector<8x32xf32>
    %113 = vector.extract_strided_slice %81 {offsets = [0, 32], sizes = [8, 32], strides = [1, 1]} : vector<8x128xf32> to vector<8x32xf32>
    %114 = arith.negf %113 : vector<8x32xf32>
    %115 = math.exp %114 : vector<8x32xf32>
    %cst_30 = arith.constant 1.000000e+00 : f32
    %116 = vector.broadcast %cst_30 : f32 to vector<8x32xf32>
    %117 = arith.addf %116, %115 : vector<8x32xf32>
    %118 = arith.divf %116, %117 : vector<8x32xf32>
    %119 = vector.extract_strided_slice %81 {offsets = [0, 64], sizes = [8, 32], strides = [1, 1]} : vector<8x128xf32> to vector<8x32xf32>
    %120 = math.tanh %119 : vector<8x32xf32>
    %121 = vector.extract_strided_slice %81 {offsets = [0, 96], sizes = [8, 32], strides = [1, 1]} : vector<8x128xf32> to vector<8x32xf32>
    %122 = arith.negf %121 : vector<8x32xf32>
    %123 = math.exp %122 : vector<8x32xf32>
    %cst_31 = arith.constant 1.000000e+00 : f32
    %124 = vector.broadcast %cst_31 : f32 to vector<8x32xf32>
    %125 = arith.addf %124, %123 : vector<8x32xf32>
    %126 = arith.divf %124, %125 : vector<8x32xf32>
    %127 = arith.mulf %118, %67 : vector<8x32xf32>
    %128 = arith.mulf %112, %120 : vector<8x32xf32>
    %129 = arith.addf %127, %128 : vector<8x32xf32>
    %130 = math.tanh %129 : vector<8x32xf32>
    %131 = arith.mulf %126, %130 : vector<8x32xf32>
    %c2_i32 = arith.constant 2 : i32
    %132 = arith.index_cast %c2_i32 : i32 to index
    %c0_32 = arith.constant 0 : index
    %c0_33 = arith.constant 0 : index
    %133 = vector.load %arg1[%132, %c0_32, %c0_33] : memref<8x8x128xf32, #tpu.memory_space<vmem>>, vector<1x8x128xf32>
    %134 = vector.shape_cast %133 : vector<1x8x128xf32> to vector<8x128xf32>
    %135 = arith.index_cast %c2_i32 : i32 to index
    %c0_34 = arith.constant 0 : index
    %c0_35 = arith.constant 0 : index
    %136 = vector.load %arg2[%135, %c0_34, %c0_35] : memref<8x8x128xf32, #tpu.memory_space<vmem>>, vector<1x8x128xf32>
    %137 = vector.shape_cast %136 : vector<1x8x128xf32> to vector<8x128xf32>
    %138 = tpu.concatenate %106, %131 in 0 : vector<8x32xf32>, vector<8x32xf32> -> vector<16x32xf32>
    %cst_36 = arith.constant dense<0.000000e+00> : vector<16x256xf32>
    %139 = tpu.matmul %138, %3, %cst_36 {dimension_numbers = #tpu.dot_dimension_numbers<[1], [0], [0], [1], [0, 0, 1, 1], [], []>} : vector<16x32xf32>, vector<32x256xf32>, vector<16x256xf32> -> vector<16x256xf32>
    %140 = vector.extract_strided_slice %139 {offsets = [0, 0], sizes = [8, 128], strides = [1, 1]} : vector<16x256xf32> to vector<8x128xf32>
    %141 = arith.addf %134, %140 : vector<8x128xf32>
    %142 = vector.extract_strided_slice %139 {offsets = [8, 128], sizes = [8, 128], strides = [1, 1]} : vector<16x256xf32> to vector<8x128xf32>
    %143 = arith.addf %137, %142 : vector<8x128xf32>
    %144 = vector.extract_strided_slice %141 {offsets = [0, 0], sizes = [8, 32], strides = [1, 1]} : vector<8x128xf32> to vector<8x32xf32>
    %145 = arith.negf %144 : vector<8x32xf32>
    %146 = math.exp %145 : vector<8x32xf32>
    %cst_37 = arith.constant 1.000000e+00 : f32
    %147 = vector.broadcast %cst_37 : f32 to vector<8x32xf32>
    %148 = arith.addf %147, %146 : vector<8x32xf32>
    %149 = arith.divf %147, %148 : vector<8x32xf32>
    %150 = vector.extract_strided_slice %141 {offsets = [0, 32], sizes = [8, 32], strides = [1, 1]} : vector<8x128xf32> to vector<8x32xf32>
    %151 = arith.negf %150 : vector<8x32xf32>
    %152 = math.exp %151 : vector<8x32xf32>
    %cst_38 = arith.constant 1.000000e+00 : f32
    %153 = vector.broadcast %cst_38 : f32 to vector<8x32xf32>
    %154 = arith.addf %153, %152 : vector<8x32xf32>
    %155 = arith.divf %153, %154 : vector<8x32xf32>
    %156 = vector.extract_strided_slice %141 {offsets = [0, 64], sizes = [8, 32], strides = [1, 1]} : vector<8x128xf32> to vector<8x32xf32>
    %157 = math.tanh %156 : vector<8x32xf32>
    %158 = vector.extract_strided_slice %141 {offsets = [0, 96], sizes = [8, 32], strides = [1, 1]} : vector<8x128xf32> to vector<8x32xf32>
    %159 = arith.negf %158 : vector<8x32xf32>
    %160 = math.exp %159 : vector<8x32xf32>
    %cst_39 = arith.constant 1.000000e+00 : f32
    %161 = vector.broadcast %cst_39 : f32 to vector<8x32xf32>
    %162 = arith.addf %161, %160 : vector<8x32xf32>
    %163 = arith.divf %161, %162 : vector<8x32xf32>
    %164 = arith.mulf %155, %104 : vector<8x32xf32>
    %165 = arith.mulf %149, %157 : vector<8x32xf32>
    %166 = arith.addf %164, %165 : vector<8x32xf32>
    %167 = math.tanh %166 : vector<8x32xf32>
    %168 = arith.mulf %163, %167 : vector<8x32xf32>
    %169 = vector.extract_strided_slice %143 {offsets = [0, 0], sizes = [8, 32], strides = [1, 1]} : vector<8x128xf32> to vector<8x32xf32>
    %170 = arith.negf %169 : vector<8x32xf32>
    %171 = math.exp %170 : vector<8x32xf32>
    %cst_40 = arith.constant 1.000000e+00 : f32
    %172 = vector.broadcast %cst_40 : f32 to vector<8x32xf32>
    %173 = arith.addf %172, %171 : vector<8x32xf32>
    %174 = arith.divf %172, %173 : vector<8x32xf32>
    %175 = vector.extract_strided_slice %143 {offsets = [0, 32], sizes = [8, 32], strides = [1, 1]} : vector<8x128xf32> to vector<8x32xf32>
    %176 = arith.negf %175 : vector<8x32xf32>
    %177 = math.exp %176 : vector<8x32xf32>
    %cst_41 = arith.constant 1.000000e+00 : f32
    %178 = vector.broadcast %cst_41 : f32 to vector<8x32xf32>
    %179 = arith.addf %178, %177 : vector<8x32xf32>
    %180 = arith.divf %178, %179 : vector<8x32xf32>
    %181 = vector.extract_strided_slice %143 {offsets = [0, 64], sizes = [8, 32], strides = [1, 1]} : vector<8x128xf32> to vector<8x32xf32>
    %182 = math.tanh %181 : vector<8x32xf32>
    %183 = vector.extract_strided_slice %143 {offsets = [0, 96], sizes = [8, 32], strides = [1, 1]} : vector<8x128xf32> to vector<8x32xf32>
    %184 = arith.negf %183 : vector<8x32xf32>
    %185 = math.exp %184 : vector<8x32xf32>
    %cst_42 = arith.constant 1.000000e+00 : f32
    %186 = vector.broadcast %cst_42 : f32 to vector<8x32xf32>
    %187 = arith.addf %186, %185 : vector<8x32xf32>
    %188 = arith.divf %186, %187 : vector<8x32xf32>
    %189 = arith.mulf %180, %129 : vector<8x32xf32>
    %190 = arith.mulf %174, %182 : vector<8x32xf32>
    %191 = arith.addf %189, %190 : vector<8x32xf32>
    %192 = math.tanh %191 : vector<8x32xf32>
    %193 = arith.mulf %188, %192 : vector<8x32xf32>
    %c3_i32 = arith.constant 3 : i32
    %194 = arith.index_cast %c3_i32 : i32 to index
    %c0_43 = arith.constant 0 : index
    %c0_44 = arith.constant 0 : index
    %195 = vector.load %arg1[%194, %c0_43, %c0_44] : memref<8x8x128xf32, #tpu.memory_space<vmem>>, vector<1x8x128xf32>
    %196 = vector.shape_cast %195 : vector<1x8x128xf32> to vector<8x128xf32>
    %197 = arith.index_cast %c3_i32 : i32 to index
    %c0_45 = arith.constant 0 : index
    %c0_46 = arith.constant 0 : index
    %198 = vector.load %arg2[%197, %c0_45, %c0_46] : memref<8x8x128xf32, #tpu.memory_space<vmem>>, vector<1x8x128xf32>
    %199 = vector.shape_cast %198 : vector<1x8x128xf32> to vector<8x128xf32>
    %200 = tpu.concatenate %168, %193 in 0 : vector<8x32xf32>, vector<8x32xf32> -> vector<16x32xf32>
    %cst_47 = arith.constant dense<0.000000e+00> : vector<16x256xf32>
    %201 = tpu.matmul %200, %3, %cst_47 {dimension_numbers = #tpu.dot_dimension_numbers<[1], [0], [0], [1], [0, 0, 1, 1], [], []>} : vector<16x32xf32>, vector<32x256xf32>, vector<16x256xf32> -> vector<16x256xf32>
    %202 = vector.extract_strided_slice %201 {offsets = [0, 0], sizes = [8, 128], strides = [1, 1]} : vector<16x256xf32> to vector<8x128xf32>
    %203 = arith.addf %196, %202 : vector<8x128xf32>
    %204 = vector.extract_strided_slice %201 {offsets = [8, 128], sizes = [8, 128], strides = [1, 1]} : vector<16x256xf32> to vector<8x128xf32>
    %205 = arith.addf %199, %204 : vector<8x128xf32>
    %206 = vector.extract_strided_slice %203 {offsets = [0, 0], sizes = [8, 32], strides = [1, 1]} : vector<8x128xf32> to vector<8x32xf32>
    %207 = arith.negf %206 : vector<8x32xf32>
    %208 = math.exp %207 : vector<8x32xf32>
    %cst_48 = arith.constant 1.000000e+00 : f32
    %209 = vector.broadcast %cst_48 : f32 to vector<8x32xf32>
    %210 = arith.addf %209, %208 : vector<8x32xf32>
    %211 = arith.divf %209, %210 : vector<8x32xf32>
    %212 = vector.extract_strided_slice %203 {offsets = [0, 32], sizes = [8, 32], strides = [1, 1]} : vector<8x128xf32> to vector<8x32xf32>
    %213 = arith.negf %212 : vector<8x32xf32>
    %214 = math.exp %213 : vector<8x32xf32>
    %cst_49 = arith.constant 1.000000e+00 : f32
    %215 = vector.broadcast %cst_49 : f32 to vector<8x32xf32>
    %216 = arith.addf %215, %214 : vector<8x32xf32>
    %217 = arith.divf %215, %216 : vector<8x32xf32>
    %218 = vector.extract_strided_slice %203 {offsets = [0, 64], sizes = [8, 32], strides = [1, 1]} : vector<8x128xf32> to vector<8x32xf32>
    %219 = math.tanh %218 : vector<8x32xf32>
    %220 = vector.extract_strided_slice %203 {offsets = [0, 96], sizes = [8, 32], strides = [1, 1]} : vector<8x128xf32> to vector<8x32xf32>
    %221 = arith.negf %220 : vector<8x32xf32>
    %222 = math.exp %221 : vector<8x32xf32>
    %cst_50 = arith.constant 1.000000e+00 : f32
    %223 = vector.broadcast %cst_50 : f32 to vector<8x32xf32>
    %224 = arith.addf %223, %222 : vector<8x32xf32>
    %225 = arith.divf %223, %224 : vector<8x32xf32>
    %226 = arith.mulf %217, %166 : vector<8x32xf32>
    %227 = arith.mulf %211, %219 : vector<8x32xf32>
    %228 = arith.addf %226, %227 : vector<8x32xf32>
    %229 = math.tanh %228 : vector<8x32xf32>
    %230 = arith.mulf %225, %229 : vector<8x32xf32>
    %231 = vector.extract_strided_slice %205 {offsets = [0, 0], sizes = [8, 32], strides = [1, 1]} : vector<8x128xf32> to vector<8x32xf32>
    %232 = arith.negf %231 : vector<8x32xf32>
    %233 = math.exp %232 : vector<8x32xf32>
    %cst_51 = arith.constant 1.000000e+00 : f32
    %234 = vector.broadcast %cst_51 : f32 to vector<8x32xf32>
    %235 = arith.addf %234, %233 : vector<8x32xf32>
    %236 = arith.divf %234, %235 : vector<8x32xf32>
    %237 = vector.extract_strided_slice %205 {offsets = [0, 32], sizes = [8, 32], strides = [1, 1]} : vector<8x128xf32> to vector<8x32xf32>
    %238 = arith.negf %237 : vector<8x32xf32>
    %239 = math.exp %238 : vector<8x32xf32>
    %cst_52 = arith.constant 1.000000e+00 : f32
    %240 = vector.broadcast %cst_52 : f32 to vector<8x32xf32>
    %241 = arith.addf %240, %239 : vector<8x32xf32>
    %242 = arith.divf %240, %241 : vector<8x32xf32>
    %243 = vector.extract_strided_slice %205 {offsets = [0, 64], sizes = [8, 32], strides = [1, 1]} : vector<8x128xf32> to vector<8x32xf32>
    %244 = math.tanh %243 : vector<8x32xf32>
    %245 = vector.extract_strided_slice %205 {offsets = [0, 96], sizes = [8, 32], strides = [1, 1]} : vector<8x128xf32> to vector<8x32xf32>
    %246 = arith.negf %245 : vector<8x32xf32>
    %247 = math.exp %246 : vector<8x32xf32>
    %cst_53 = arith.constant 1.000000e+00 : f32
    %248 = vector.broadcast %cst_53 : f32 to vector<8x32xf32>
    %249 = arith.addf %248, %247 : vector<8x32xf32>
    %250 = arith.divf %248, %249 : vector<8x32xf32>
    %251 = arith.mulf %242, %191 : vector<8x32xf32>
    %252 = arith.mulf %236, %244 : vector<8x32xf32>
    %253 = arith.addf %251, %252 : vector<8x32xf32>
    %254 = math.tanh %253 : vector<8x32xf32>
    %255 = arith.mulf %250, %254 : vector<8x32xf32>
    %c4_i32 = arith.constant 4 : i32
    %256 = arith.index_cast %c4_i32 : i32 to index
    %c0_54 = arith.constant 0 : index
    %c0_55 = arith.constant 0 : index
    %257 = vector.load %arg1[%256, %c0_54, %c0_55] : memref<8x8x128xf32, #tpu.memory_space<vmem>>, vector<1x8x128xf32>
    %258 = vector.shape_cast %257 : vector<1x8x128xf32> to vector<8x128xf32>
    %259 = arith.index_cast %c4_i32 : i32 to index
    %c0_56 = arith.constant 0 : index
    %c0_57 = arith.constant 0 : index
    %260 = vector.load %arg2[%259, %c0_56, %c0_57] : memref<8x8x128xf32, #tpu.memory_space<vmem>>, vector<1x8x128xf32>
    %261 = vector.shape_cast %260 : vector<1x8x128xf32> to vector<8x128xf32>
    %262 = tpu.concatenate %230, %255 in 0 : vector<8x32xf32>, vector<8x32xf32> -> vector<16x32xf32>
    %cst_58 = arith.constant dense<0.000000e+00> : vector<16x256xf32>
    %263 = tpu.matmul %262, %3, %cst_58 {dimension_numbers = #tpu.dot_dimension_numbers<[1], [0], [0], [1], [0, 0, 1, 1], [], []>} : vector<16x32xf32>, vector<32x256xf32>, vector<16x256xf32> -> vector<16x256xf32>
    %264 = vector.extract_strided_slice %263 {offsets = [0, 0], sizes = [8, 128], strides = [1, 1]} : vector<16x256xf32> to vector<8x128xf32>
    %265 = arith.addf %258, %264 : vector<8x128xf32>
    %266 = vector.extract_strided_slice %263 {offsets = [8, 128], sizes = [8, 128], strides = [1, 1]} : vector<16x256xf32> to vector<8x128xf32>
    %267 = arith.addf %261, %266 : vector<8x128xf32>
    %268 = vector.extract_strided_slice %265 {offsets = [0, 0], sizes = [8, 32], strides = [1, 1]} : vector<8x128xf32> to vector<8x32xf32>
    %269 = arith.negf %268 : vector<8x32xf32>
    %270 = math.exp %269 : vector<8x32xf32>
    %cst_59 = arith.constant 1.000000e+00 : f32
    %271 = vector.broadcast %cst_59 : f32 to vector<8x32xf32>
    %272 = arith.addf %271, %270 : vector<8x32xf32>
    %273 = arith.divf %271, %272 : vector<8x32xf32>
    %274 = vector.extract_strided_slice %265 {offsets = [0, 32], sizes = [8, 32], strides = [1, 1]} : vector<8x128xf32> to vector<8x32xf32>
    %275 = arith.negf %274 : vector<8x32xf32>
    %276 = math.exp %275 : vector<8x32xf32>
    %cst_60 = arith.constant 1.000000e+00 : f32
    %277 = vector.broadcast %cst_60 : f32 to vector<8x32xf32>
    %278 = arith.addf %277, %276 : vector<8x32xf32>
    %279 = arith.divf %277, %278 : vector<8x32xf32>
    %280 = vector.extract_strided_slice %265 {offsets = [0, 64], sizes = [8, 32], strides = [1, 1]} : vector<8x128xf32> to vector<8x32xf32>
    %281 = math.tanh %280 : vector<8x32xf32>
    %282 = vector.extract_strided_slice %265 {offsets = [0, 96], sizes = [8, 32], strides = [1, 1]} : vector<8x128xf32> to vector<8x32xf32>
    %283 = arith.negf %282 : vector<8x32xf32>
    %284 = math.exp %283 : vector<8x32xf32>
    %cst_61 = arith.constant 1.000000e+00 : f32
    %285 = vector.broadcast %cst_61 : f32 to vector<8x32xf32>
    %286 = arith.addf %285, %284 : vector<8x32xf32>
    %287 = arith.divf %285, %286 : vector<8x32xf32>
    %288 = arith.mulf %279, %228 : vector<8x32xf32>
    %289 = arith.mulf %273, %281 : vector<8x32xf32>
    %290 = arith.addf %288, %289 : vector<8x32xf32>
    %291 = math.tanh %290 : vector<8x32xf32>
    %292 = arith.mulf %287, %291 : vector<8x32xf32>
    %293 = vector.extract_strided_slice %267 {offsets = [0, 0], sizes = [8, 32], strides = [1, 1]} : vector<8x128xf32> to vector<8x32xf32>
    %294 = arith.negf %293 : vector<8x32xf32>
    %295 = math.exp %294 : vector<8x32xf32>
    %cst_62 = arith.constant 1.000000e+00 : f32
    %296 = vector.broadcast %cst_62 : f32 to vector<8x32xf32>
    %297 = arith.addf %296, %295 : vector<8x32xf32>
    %298 = arith.divf %296, %297 : vector<8x32xf32>
    %299 = vector.extract_strided_slice %267 {offsets = [0, 32], sizes = [8, 32], strides = [1, 1]} : vector<8x128xf32> to vector<8x32xf32>
    %300 = arith.negf %299 : vector<8x32xf32>
    %301 = math.exp %300 : vector<8x32xf32>
    %cst_63 = arith.constant 1.000000e+00 : f32
    %302 = vector.broadcast %cst_63 : f32 to vector<8x32xf32>
    %303 = arith.addf %302, %301 : vector<8x32xf32>
    %304 = arith.divf %302, %303 : vector<8x32xf32>
    %305 = vector.extract_strided_slice %267 {offsets = [0, 64], sizes = [8, 32], strides = [1, 1]} : vector<8x128xf32> to vector<8x32xf32>
    %306 = math.tanh %305 : vector<8x32xf32>
    %307 = vector.extract_strided_slice %267 {offsets = [0, 96], sizes = [8, 32], strides = [1, 1]} : vector<8x128xf32> to vector<8x32xf32>
    %308 = arith.negf %307 : vector<8x32xf32>
    %309 = math.exp %308 : vector<8x32xf32>
    %cst_64 = arith.constant 1.000000e+00 : f32
    %310 = vector.broadcast %cst_64 : f32 to vector<8x32xf32>
    %311 = arith.addf %310, %309 : vector<8x32xf32>
    %312 = arith.divf %310, %311 : vector<8x32xf32>
    %313 = arith.mulf %304, %253 : vector<8x32xf32>
    %314 = arith.mulf %298, %306 : vector<8x32xf32>
    %315 = arith.addf %313, %314 : vector<8x32xf32>
    %316 = math.tanh %315 : vector<8x32xf32>
    %317 = arith.mulf %312, %316 : vector<8x32xf32>
    %c5_i32 = arith.constant 5 : i32
    %318 = arith.index_cast %c5_i32 : i32 to index
    %c0_65 = arith.constant 0 : index
    %c0_66 = arith.constant 0 : index
    %319 = vector.load %arg1[%318, %c0_65, %c0_66] : memref<8x8x128xf32, #tpu.memory_space<vmem>>, vector<1x8x128xf32>
    %320 = vector.shape_cast %319 : vector<1x8x128xf32> to vector<8x128xf32>
    %321 = arith.index_cast %c5_i32 : i32 to index
    %c0_67 = arith.constant 0 : index
    %c0_68 = arith.constant 0 : index
    %322 = vector.load %arg2[%321, %c0_67, %c0_68] : memref<8x8x128xf32, #tpu.memory_space<vmem>>, vector<1x8x128xf32>
    %323 = vector.shape_cast %322 : vector<1x8x128xf32> to vector<8x128xf32>
    %324 = tpu.concatenate %292, %317 in 0 : vector<8x32xf32>, vector<8x32xf32> -> vector<16x32xf32>
    %cst_69 = arith.constant dense<0.000000e+00> : vector<16x256xf32>
    %325 = tpu.matmul %324, %3, %cst_69 {dimension_numbers = #tpu.dot_dimension_numbers<[1], [0], [0], [1], [0, 0, 1, 1], [], []>} : vector<16x32xf32>, vector<32x256xf32>, vector<16x256xf32> -> vector<16x256xf32>
    %326 = vector.extract_strided_slice %325 {offsets = [0, 0], sizes = [8, 128], strides = [1, 1]} : vector<16x256xf32> to vector<8x128xf32>
    %327 = arith.addf %320, %326 : vector<8x128xf32>
    %328 = vector.extract_strided_slice %325 {offsets = [8, 128], sizes = [8, 128], strides = [1, 1]} : vector<16x256xf32> to vector<8x128xf32>
    %329 = arith.addf %323, %328 : vector<8x128xf32>
    %330 = vector.extract_strided_slice %327 {offsets = [0, 0], sizes = [8, 32], strides = [1, 1]} : vector<8x128xf32> to vector<8x32xf32>
    %331 = arith.negf %330 : vector<8x32xf32>
    %332 = math.exp %331 : vector<8x32xf32>
    %cst_70 = arith.constant 1.000000e+00 : f32
    %333 = vector.broadcast %cst_70 : f32 to vector<8x32xf32>
    %334 = arith.addf %333, %332 : vector<8x32xf32>
    %335 = arith.divf %333, %334 : vector<8x32xf32>
    %336 = vector.extract_strided_slice %327 {offsets = [0, 32], sizes = [8, 32], strides = [1, 1]} : vector<8x128xf32> to vector<8x32xf32>
    %337 = arith.negf %336 : vector<8x32xf32>
    %338 = math.exp %337 : vector<8x32xf32>
    %cst_71 = arith.constant 1.000000e+00 : f32
    %339 = vector.broadcast %cst_71 : f32 to vector<8x32xf32>
    %340 = arith.addf %339, %338 : vector<8x32xf32>
    %341 = arith.divf %339, %340 : vector<8x32xf32>
    %342 = vector.extract_strided_slice %327 {offsets = [0, 64], sizes = [8, 32], strides = [1, 1]} : vector<8x128xf32> to vector<8x32xf32>
    %343 = math.tanh %342 : vector<8x32xf32>
    %344 = vector.extract_strided_slice %327 {offsets = [0, 96], sizes = [8, 32], strides = [1, 1]} : vector<8x128xf32> to vector<8x32xf32>
    %345 = arith.negf %344 : vector<8x32xf32>
    %346 = math.exp %345 : vector<8x32xf32>
    %cst_72 = arith.constant 1.000000e+00 : f32
    %347 = vector.broadcast %cst_72 : f32 to vector<8x32xf32>
    %348 = arith.addf %347, %346 : vector<8x32xf32>
    %349 = arith.divf %347, %348 : vector<8x32xf32>
    %350 = arith.mulf %341, %290 : vector<8x32xf32>
    %351 = arith.mulf %335, %343 : vector<8x32xf32>
    %352 = arith.addf %350, %351 : vector<8x32xf32>
    %353 = math.tanh %352 : vector<8x32xf32>
    %354 = arith.mulf %349, %353 : vector<8x32xf32>
    %355 = vector.extract_strided_slice %329 {offsets = [0, 0], sizes = [8, 32], strides = [1, 1]} : vector<8x128xf32> to vector<8x32xf32>
    %356 = arith.negf %355 : vector<8x32xf32>
    %357 = math.exp %356 : vector<8x32xf32>
    %cst_73 = arith.constant 1.000000e+00 : f32
    %358 = vector.broadcast %cst_73 : f32 to vector<8x32xf32>
    %359 = arith.addf %358, %357 : vector<8x32xf32>
    %360 = arith.divf %358, %359 : vector<8x32xf32>
    %361 = vector.extract_strided_slice %329 {offsets = [0, 32], sizes = [8, 32], strides = [1, 1]} : vector<8x128xf32> to vector<8x32xf32>
    %362 = arith.negf %361 : vector<8x32xf32>
    %363 = math.exp %362 : vector<8x32xf32>
    %cst_74 = arith.constant 1.000000e+00 : f32
    %364 = vector.broadcast %cst_74 : f32 to vector<8x32xf32>
    %365 = arith.addf %364, %363 : vector<8x32xf32>
    %366 = arith.divf %364, %365 : vector<8x32xf32>
    %367 = vector.extract_strided_slice %329 {offsets = [0, 64], sizes = [8, 32], strides = [1, 1]} : vector<8x128xf32> to vector<8x32xf32>
    %368 = math.tanh %367 : vector<8x32xf32>
    %369 = vector.extract_strided_slice %329 {offsets = [0, 96], sizes = [8, 32], strides = [1, 1]} : vector<8x128xf32> to vector<8x32xf32>
    %370 = arith.negf %369 : vector<8x32xf32>
    %371 = math.exp %370 : vector<8x32xf32>
    %cst_75 = arith.constant 1.000000e+00 : f32
    %372 = vector.broadcast %cst_75 : f32 to vector<8x32xf32>
    %373 = arith.addf %372, %371 : vector<8x32xf32>
    %374 = arith.divf %372, %373 : vector<8x32xf32>
    %375 = arith.mulf %366, %315 : vector<8x32xf32>
    %376 = arith.mulf %360, %368 : vector<8x32xf32>
    %377 = arith.addf %375, %376 : vector<8x32xf32>
    %378 = math.tanh %377 : vector<8x32xf32>
    %379 = arith.mulf %374, %378 : vector<8x32xf32>
    %c6_i32 = arith.constant 6 : i32
    %380 = arith.index_cast %c6_i32 : i32 to index
    %c0_76 = arith.constant 0 : index
    %c0_77 = arith.constant 0 : index
    %381 = vector.load %arg1[%380, %c0_76, %c0_77] : memref<8x8x128xf32, #tpu.memory_space<vmem>>, vector<1x8x128xf32>
    %382 = vector.shape_cast %381 : vector<1x8x128xf32> to vector<8x128xf32>
    %383 = arith.index_cast %c6_i32 : i32 to index
    %c0_78 = arith.constant 0 : index
    %c0_79 = arith.constant 0 : index
    %384 = vector.load %arg2[%383, %c0_78, %c0_79] : memref<8x8x128xf32, #tpu.memory_space<vmem>>, vector<1x8x128xf32>
    %385 = vector.shape_cast %384 : vector<1x8x128xf32> to vector<8x128xf32>
    %386 = tpu.concatenate %354, %379 in 0 : vector<8x32xf32>, vector<8x32xf32> -> vector<16x32xf32>
    %cst_80 = arith.constant dense<0.000000e+00> : vector<16x256xf32>
    %387 = tpu.matmul %386, %3, %cst_80 {dimension_numbers = #tpu.dot_dimension_numbers<[1], [0], [0], [1], [0, 0, 1, 1], [], []>} : vector<16x32xf32>, vector<32x256xf32>, vector<16x256xf32> -> vector<16x256xf32>
    %388 = vector.extract_strided_slice %387 {offsets = [0, 0], sizes = [8, 128], strides = [1, 1]} : vector<16x256xf32> to vector<8x128xf32>
    %389 = arith.addf %382, %388 : vector<8x128xf32>
    %390 = vector.extract_strided_slice %387 {offsets = [8, 128], sizes = [8, 128], strides = [1, 1]} : vector<16x256xf32> to vector<8x128xf32>
    %391 = arith.addf %385, %390 : vector<8x128xf32>
    %392 = vector.extract_strided_slice %389 {offsets = [0, 0], sizes = [8, 32], strides = [1, 1]} : vector<8x128xf32> to vector<8x32xf32>
    %393 = arith.negf %392 : vector<8x32xf32>
    %394 = math.exp %393 : vector<8x32xf32>
    %cst_81 = arith.constant 1.000000e+00 : f32
    %395 = vector.broadcast %cst_81 : f32 to vector<8x32xf32>
    %396 = arith.addf %395, %394 : vector<8x32xf32>
    %397 = arith.divf %395, %396 : vector<8x32xf32>
    %398 = vector.extract_strided_slice %389 {offsets = [0, 32], sizes = [8, 32], strides = [1, 1]} : vector<8x128xf32> to vector<8x32xf32>
    %399 = arith.negf %398 : vector<8x32xf32>
    %400 = math.exp %399 : vector<8x32xf32>
    %cst_82 = arith.constant 1.000000e+00 : f32
    %401 = vector.broadcast %cst_82 : f32 to vector<8x32xf32>
    %402 = arith.addf %401, %400 : vector<8x32xf32>
    %403 = arith.divf %401, %402 : vector<8x32xf32>
    %404 = vector.extract_strided_slice %389 {offsets = [0, 64], sizes = [8, 32], strides = [1, 1]} : vector<8x128xf32> to vector<8x32xf32>
    %405 = math.tanh %404 : vector<8x32xf32>
    %406 = vector.extract_strided_slice %389 {offsets = [0, 96], sizes = [8, 32], strides = [1, 1]} : vector<8x128xf32> to vector<8x32xf32>
    %407 = arith.negf %406 : vector<8x32xf32>
    %408 = math.exp %407 : vector<8x32xf32>
    %cst_83 = arith.constant 1.000000e+00 : f32
    %409 = vector.broadcast %cst_83 : f32 to vector<8x32xf32>
    %410 = arith.addf %409, %408 : vector<8x32xf32>
    %411 = arith.divf %409, %410 : vector<8x32xf32>
    %412 = arith.mulf %403, %352 : vector<8x32xf32>
    %413 = arith.mulf %397, %405 : vector<8x32xf32>
    %414 = arith.addf %412, %413 : vector<8x32xf32>
    %415 = math.tanh %414 : vector<8x32xf32>
    %416 = arith.mulf %411, %415 : vector<8x32xf32>
    %417 = vector.extract_strided_slice %391 {offsets = [0, 0], sizes = [8, 32], strides = [1, 1]} : vector<8x128xf32> to vector<8x32xf32>
    %418 = arith.negf %417 : vector<8x32xf32>
    %419 = math.exp %418 : vector<8x32xf32>
    %cst_84 = arith.constant 1.000000e+00 : f32
    %420 = vector.broadcast %cst_84 : f32 to vector<8x32xf32>
    %421 = arith.addf %420, %419 : vector<8x32xf32>
    %422 = arith.divf %420, %421 : vector<8x32xf32>
    %423 = vector.extract_strided_slice %391 {offsets = [0, 32], sizes = [8, 32], strides = [1, 1]} : vector<8x128xf32> to vector<8x32xf32>
    %424 = arith.negf %423 : vector<8x32xf32>
    %425 = math.exp %424 : vector<8x32xf32>
    %cst_85 = arith.constant 1.000000e+00 : f32
    %426 = vector.broadcast %cst_85 : f32 to vector<8x32xf32>
    %427 = arith.addf %426, %425 : vector<8x32xf32>
    %428 = arith.divf %426, %427 : vector<8x32xf32>
    %429 = vector.extract_strided_slice %391 {offsets = [0, 64], sizes = [8, 32], strides = [1, 1]} : vector<8x128xf32> to vector<8x32xf32>
    %430 = math.tanh %429 : vector<8x32xf32>
    %431 = vector.extract_strided_slice %391 {offsets = [0, 96], sizes = [8, 32], strides = [1, 1]} : vector<8x128xf32> to vector<8x32xf32>
    %432 = arith.negf %431 : vector<8x32xf32>
    %433 = math.exp %432 : vector<8x32xf32>
    %cst_86 = arith.constant 1.000000e+00 : f32
    %434 = vector.broadcast %cst_86 : f32 to vector<8x32xf32>
    %435 = arith.addf %434, %433 : vector<8x32xf32>
    %436 = arith.divf %434, %435 : vector<8x32xf32>
    %437 = arith.mulf %428, %377 : vector<8x32xf32>
    %438 = arith.mulf %422, %430 : vector<8x32xf32>
    %439 = arith.addf %437, %438 : vector<8x32xf32>
    %440 = math.tanh %439 : vector<8x32xf32>
    %441 = arith.mulf %436, %440 : vector<8x32xf32>
    %c7_i32 = arith.constant 7 : i32
    %442 = arith.index_cast %c7_i32 : i32 to index
    %c0_87 = arith.constant 0 : index
    %c0_88 = arith.constant 0 : index
    %443 = vector.load %arg1[%442, %c0_87, %c0_88] : memref<8x8x128xf32, #tpu.memory_space<vmem>>, vector<1x8x128xf32>
    %444 = vector.shape_cast %443 : vector<1x8x128xf32> to vector<8x128xf32>
    %445 = arith.index_cast %c7_i32 : i32 to index
    %c0_89 = arith.constant 0 : index
    %c0_90 = arith.constant 0 : index
    %446 = vector.load %arg2[%445, %c0_89, %c0_90] : memref<8x8x128xf32, #tpu.memory_space<vmem>>, vector<1x8x128xf32>
    %447 = vector.shape_cast %446 : vector<1x8x128xf32> to vector<8x128xf32>
    %448 = tpu.concatenate %416, %441 in 0 : vector<8x32xf32>, vector<8x32xf32> -> vector<16x32xf32>
    %cst_91 = arith.constant dense<0.000000e+00> : vector<16x256xf32>
    %449 = tpu.matmul %448, %3, %cst_91 {dimension_numbers = #tpu.dot_dimension_numbers<[1], [0], [0], [1], [0, 0, 1, 1], [], []>} : vector<16x32xf32>, vector<32x256xf32>, vector<16x256xf32> -> vector<16x256xf32>
    %450 = vector.extract_strided_slice %449 {offsets = [0, 0], sizes = [8, 128], strides = [1, 1]} : vector<16x256xf32> to vector<8x128xf32>
    %451 = arith.addf %444, %450 : vector<8x128xf32>
    %452 = vector.extract_strided_slice %449 {offsets = [8, 128], sizes = [8, 128], strides = [1, 1]} : vector<16x256xf32> to vector<8x128xf32>
    %453 = arith.addf %447, %452 : vector<8x128xf32>
    %454 = vector.extract_strided_slice %451 {offsets = [0, 0], sizes = [8, 32], strides = [1, 1]} : vector<8x128xf32> to vector<8x32xf32>
    %455 = arith.negf %454 : vector<8x32xf32>
    %456 = math.exp %455 : vector<8x32xf32>
    %cst_92 = arith.constant 1.000000e+00 : f32
    %457 = vector.broadcast %cst_92 : f32 to vector<8x32xf32>
    %458 = arith.addf %457, %456 : vector<8x32xf32>
    %459 = arith.divf %457, %458 : vector<8x32xf32>
    %460 = vector.extract_strided_slice %451 {offsets = [0, 32], sizes = [8, 32], strides = [1, 1]} : vector<8x128xf32> to vector<8x32xf32>
    %461 = arith.negf %460 : vector<8x32xf32>
    %462 = math.exp %461 : vector<8x32xf32>
    %cst_93 = arith.constant 1.000000e+00 : f32
    %463 = vector.broadcast %cst_93 : f32 to vector<8x32xf32>
    %464 = arith.addf %463, %462 : vector<8x32xf32>
    %465 = arith.divf %463, %464 : vector<8x32xf32>
    %466 = vector.extract_strided_slice %451 {offsets = [0, 64], sizes = [8, 32], strides = [1, 1]} : vector<8x128xf32> to vector<8x32xf32>
    %467 = math.tanh %466 : vector<8x32xf32>
    %468 = vector.extract_strided_slice %451 {offsets = [0, 96], sizes = [8, 32], strides = [1, 1]} : vector<8x128xf32> to vector<8x32xf32>
    %469 = arith.negf %468 : vector<8x32xf32>
    %470 = math.exp %469 : vector<8x32xf32>
    %cst_94 = arith.constant 1.000000e+00 : f32
    %471 = vector.broadcast %cst_94 : f32 to vector<8x32xf32>
    %472 = arith.addf %471, %470 : vector<8x32xf32>
    %473 = arith.divf %471, %472 : vector<8x32xf32>
    %474 = arith.mulf %465, %414 : vector<8x32xf32>
    %475 = arith.mulf %459, %467 : vector<8x32xf32>
    %476 = arith.addf %474, %475 : vector<8x32xf32>
    %477 = math.tanh %476 : vector<8x32xf32>
    %478 = arith.mulf %473, %477 : vector<8x32xf32>
    %479 = vector.extract_strided_slice %453 {offsets = [0, 0], sizes = [8, 32], strides = [1, 1]} : vector<8x128xf32> to vector<8x32xf32>
    %480 = arith.negf %479 : vector<8x32xf32>
    %481 = math.exp %480 : vector<8x32xf32>
    %cst_95 = arith.constant 1.000000e+00 : f32
    %482 = vector.broadcast %cst_95 : f32 to vector<8x32xf32>
    %483 = arith.addf %482, %481 : vector<8x32xf32>
    %484 = arith.divf %482, %483 : vector<8x32xf32>
    %485 = vector.extract_strided_slice %453 {offsets = [0, 32], sizes = [8, 32], strides = [1, 1]} : vector<8x128xf32> to vector<8x32xf32>
    %486 = arith.negf %485 : vector<8x32xf32>
    %487 = math.exp %486 : vector<8x32xf32>
    %cst_96 = arith.constant 1.000000e+00 : f32
    %488 = vector.broadcast %cst_96 : f32 to vector<8x32xf32>
    %489 = arith.addf %488, %487 : vector<8x32xf32>
    %490 = arith.divf %488, %489 : vector<8x32xf32>
    %491 = vector.extract_strided_slice %453 {offsets = [0, 64], sizes = [8, 32], strides = [1, 1]} : vector<8x128xf32> to vector<8x32xf32>
    %492 = math.tanh %491 : vector<8x32xf32>
    %493 = vector.extract_strided_slice %453 {offsets = [0, 96], sizes = [8, 32], strides = [1, 1]} : vector<8x128xf32> to vector<8x32xf32>
    %494 = arith.negf %493 : vector<8x32xf32>
    %495 = math.exp %494 : vector<8x32xf32>
    %cst_97 = arith.constant 1.000000e+00 : f32
    %496 = vector.broadcast %cst_97 : f32 to vector<8x32xf32>
    %497 = arith.addf %496, %495 : vector<8x32xf32>
    %498 = arith.divf %496, %497 : vector<8x32xf32>
    %499 = arith.mulf %490, %439 : vector<8x32xf32>
    %500 = arith.mulf %484, %492 : vector<8x32xf32>
    %501 = arith.addf %499, %500 : vector<8x32xf32>
    %502 = math.tanh %501 : vector<8x32xf32>
    %503 = arith.mulf %498, %502 : vector<8x32xf32>
    %c8_i32 = arith.constant 8 : i32
    %c0_98 = arith.constant 0 : index
    %c0_99 = arith.constant 0 : index
    %504 = vector.load %arg8[%c0_98, %c0_99] : memref<8x32xf32, #tpu.memory_space<vmem>>, vector<8x32xf32>
    tpu.vector_store %arg8[%c0_98, %c0_99], %478 {strides = array<i32>} : memref<8x32xf32, #tpu.memory_space<vmem>>, vector<8x32xf32>,
    %c0_100 = arith.constant 0 : index
    %c0_101 = arith.constant 0 : index
    %505 = vector.load %arg9[%c0_100, %c0_101] : memref<8x32xf32, #tpu.memory_space<vmem>>, vector<8x32xf32>
    tpu.vector_store %arg9[%c0_100, %c0_101], %476 {strides = array<i32>} : memref<8x32xf32, #tpu.memory_space<vmem>>, vector<8x32xf32>,
    %c0_102 = arith.constant 0 : index
    %c0_103 = arith.constant 0 : index
    %506 = vector.load %arg10[%c0_102, %c0_103] : memref<8x32xf32, #tpu.memory_space<vmem>>, vector<8x32xf32>
    tpu.vector_store %arg10[%c0_102, %c0_103], %503 {strides = array<i32>} : memref<8x32xf32, #tpu.memory_space<vmem>>, vector<8x32xf32>,
    %c0_104 = arith.constant 0 : index
    %c0_105 = arith.constant 0 : index
    %507 = vector.load %arg11[%c0_104, %c0_105] : memref<8x32xf32, #tpu.memory_space<vmem>>, vector<8x32xf32>
    tpu.vector_store %arg11[%c0_104, %c0_105], %501 {strides = array<i32>} : memref<8x32xf32, #tpu.memory_space<vmem>>, vector<8x32xf32>,
    %c0_i32_106 = arith.constant 0 : i32
    %508 = arith.cmpi eq, %arg0, %c0_i32_106 : i32
    %509 = arith.extui %508 : i1 to i32
    %c0_i32_107 = arith.constant 0 : i32
    %510 = arith.cmpi ne, %509, %c0_i32_107 : i32
    scf.if %510 {
      %c0_108 = arith.constant 0 : index
      %c0_109 = arith.constant 0 : index
      %511 = vector.load %arg4[%c0_108, %c0_109] : memref<32x128xf32, #tpu.memory_space<vmem>>, vector<32x128xf32>
      %cst_110 = arith.constant dense<0.000000e+00> : vector<8x128xf32>
      %512 = tpu.matmul %478, %511, %cst_110 {dimension_numbers = #tpu.dot_dimension_numbers<[1], [0], [0], [1], [0, 0, 1, 1], [], []>} : vector<8x32xf32>, vector<32x128xf32>, vector<8x128xf32> -> vector<8x128xf32>
      %c0_111 = arith.constant 0 : index
      %c0_112 = arith.constant 0 : index
      %513 = vector.load %arg5[%c0_111, %c0_112] : memref<32x128xf32, #tpu.memory_space<vmem>>, vector<32x128xf32>
      %cst_113 = arith.constant dense<0.000000e+00> : vector<8x128xf32>
      %514 = tpu.matmul %503, %513, %cst_113 {dimension_numbers = #tpu.dot_dimension_numbers<[1], [0], [0], [1], [0, 0, 1, 1], [], []>} : vector<8x32xf32>, vector<32x128xf32>, vector<8x128xf32> -> vector<8x128xf32>
      %515 = arith.addf %512, %514 : vector<8x128xf32>
      %c0_114 = arith.constant 0 : index
      %c0_115 = arith.constant 0 : index
      %516 = vector.load %arg6[%c0_114, %c0_115] : memref<1x128xf32, #tpu.memory_space<vmem>>, vector<1x128xf32>
      %517 = vector.broadcast %516 : vector<1x128xf32> to vector<8x128xf32>
      %518 = arith.addf %515, %517 : vector<8x128xf32>
      %c0_116 = arith.constant 0 : index
      %c0_117 = arith.constant 0 : index
      %519 = vector.load %arg7[%c0_116, %c0_117] : memref<8x128xf32, #tpu.memory_space<vmem>>, vector<8x128xf32>
      tpu.vector_store %arg7[%c0_116, %c0_117], %518 {strides = array<i32>} : memref<8x128xf32, #tpu.memory_space<vmem>>, vector<8x128xf32>,
    } else {
    }
    return
  }
  func.func @transform_0(%arg0: i32) -> (i32, i32, i32) {
    %c0_i32 = arith.constant 0 : i32
    %c0_i32_0 = arith.constant 0 : i32
    %c0_i32_1 = arith.constant 0 : i32
    return %arg0, %c0_i32, %c0_i32_0 : i32, i32, i32
  }
  func.func @transform_1(%arg0: i32) -> (i32, i32, i32) {
    %c0_i32 = arith.constant 0 : i32
    %c0_i32_0 = arith.constant 0 : i32
    %c0_i32_1 = arith.constant 0 : i32
    return %arg0, %c0_i32, %c0_i32_0 : i32, i32, i32
  }
  func.func @transform_2(%arg0: i32) -> (i32, i32) {
    %c0_i32 = arith.constant 0 : i32
    %c0_i32_0 = arith.constant 0 : i32
    %c0_i32_1 = arith.constant 0 : i32
    return %c0_i32, %c0_i32_0 : i32, i32
  }
  func.func @transform_3(%arg0: i32) -> (i32, i32) {
    %c0_i32 = arith.constant 0 : i32
    %c0_i32_0 = arith.constant 0 : i32
    %c0_i32_1 = arith.constant 0 : i32
    return %c0_i32, %c0_i32_0 : i32, i32
  }
  func.func @transform_4(%arg0: i32) -> (i32, i32) {
    %c0_i32 = arith.constant 0 : i32
    %c0_i32_0 = arith.constant 0 : i32
    %c0_i32_1 = arith.constant 0 : i32
    return %c0_i32, %c0_i32_0 : i32, i32
  }
  func.func @transform_5(%arg0: i32) -> (i32, i32) {
    %c0_i32 = arith.constant 0 : i32
    %c0_i32_0 = arith.constant 0 : i32
    %c0_i32_1 = arith.constant 0 : i32
    return %c0_i32, %c0_i32_0 : i32, i32
  }
  func.func @transform_6(%arg0: i32) -> (i32, i32) {
    %c0_i32 = arith.constant 0 : i32
    %c0_i32_0 = arith.constant 0 : i32
    %c0_i32_1 = arith.constant 0 : i32
    return %c0_i32, %c0_i32_0 : i32, i32
  }
}

</mosaic_0001>

<bundles_post_ra>
// kernel: tpu_custom_call.1
= control target key start
LH: loop header
LB: loop body
LE: loop exit
PB: predicated region body
PF: predicated region fallthrough
CT: control target
= control target key end

     0   :  { %11 = vsyncpa [#allocation7], 0  ;;  %s1969_s0 = inlined_call_operand.hbm [shape: f32[8,8,128], index: 0, kind: input, shape index: {}]   ;;  %s1970_s1 = inlined_call_operand.hbm [shape: f32[8,8,128], index: 1, kind: input, shape index: {}]   ;;  %s1971_s2 = inlined_call_operand.hbm [shape: f32[32,256], index: 2, kind: input, shape index: {}]   ;;  %s1972_s3 = inlined_call_operand.hbm [shape: f32[32,128], index: 3, kind: input, shape index: {}]   ;;  %s1973_s4 = inlined_call_operand.hbm [shape: f32[32,128], index: 4, kind: input, shape index: {}]   ;;  %s1974_s5 = inlined_call_operand.vmem [shape: f32[1,128], index: 5, kind: input, shape index: {}]   ;;  %s1975_s6 = inlined_call_operand.hbm [shape: f32[8,128], index: 6, kind: output, shape index: {}]  }
   0x1   :  { %12 = vsyncpa [#allocation10], 0 }
   0x2   :  { %13 = vsyncpa [#allocation13], 0 }
   0x3   :  { %14 = vsyncpa [#allocation8], 0  ;;  %s32_s23 = sshll.u32 %s1970_s1, 4  ;;  %s1643_s24 = smov [#allocation9]   ;;  %s33_s23 = int_to_ptr.hbm [resolvable:$true] %s32_s23 }
   0x4   :  { %s34_s25 = sshll.u32 %s1643_s24, 4  ;;  %s58_s28 = sshll.u32 %s1972_s3, 4  ;;  %s35_s25 = int_to_ptr.vmem [resolvable:$true] %s34_s25  ;;  %s59_s28 = int_to_ptr.hbm [resolvable:$true] %s58_s28 }
   0x5   :  { %s1644_s29 = smov 128   ;;  %s1645_s30 = smov 8  }
   0x6   :  { %40 = dma.hbm_to_vmem [thread:$0]  %s33_s23, 1024, %s35_s25, [#allocation10], %s1644_s29, %s1644_s29, %s1645_s30  }
   0x7   :  { %s1646_s7 = smov [#allocation12]   ;;  %s19_s1 = sshll.u32 %s1969_s0, 4  ;;  %s20_s1 = int_to_ptr.hbm [resolvable:$true] %s19_s1 }
   0x8   :  { %s60_s8 = sshll.u32 %s1646_s7, 4  ;;  %s45_s12 = sshll.u32 %s1971_s2, 4  ;;  %s61_s8 = int_to_ptr.vmem [resolvable:$true] %s60_s8  ;;  %s46_s12 = int_to_ptr.hbm [resolvable:$true] %s45_s12 }
   0x9   :  { %66 = dma.hbm_to_vmem [thread:$0]  %s59_s28, 512, %s61_s8, [#allocation13], %s1644_s29, %s1644_s29, %s1645_s30  }
   0xa   :  { %s1647_s13 = smov [#allocation6]   ;;  %s1648_s15 = smov [#allocation11]  }
   0xb   :  { %s21_s14 = sshll.u32 %s1647_s13, 4  ;;  %s47_s0 = sshll.u32 %s1648_s15, 4  ;;  %s22_s14 = int_to_ptr.vmem [resolvable:$true] %s21_s14  ;;  %s48_s0 = int_to_ptr.vmem [resolvable:$true] %s47_s0 }
   0xc   :  { %27 = dma.hbm_to_vmem [thread:$0]  %s20_s1, 1024, %s22_s14, [#allocation7], %s1644_s29, %s1644_s29, %s1645_s30  }
   0xd   :  { %s1649_s16 = smov 256   ;;  %s1650_s17 = smov 16  }
   0xe   :  { %53 = dma.hbm_to_vmem [thread:$0]  %s46_s12, 1024, %s48_s0, [#allocation10], %s1649_s16, %s1649_s16, %s1650_s17  }
   0xf   :  { %s71_s20 = sshll.u32 %s1973_s4, 4  ;;  %s1651_s2 = smov [#allocation14]   ;;  %s72_s20 = int_to_ptr.hbm [resolvable:$true] %s71_s20 }
  0x10   :  { %s73_s21 = sshll.u32 %s1651_s2, 4  ;;  %s74_s21 = int_to_ptr.vmem [resolvable:$true] %s73_s21 }
  0x11   :  { %79 = dma.hbm_to_vmem [thread:$0]  %s72_s20, 512, %s74_s21, [#allocation13], %s1644_s29, %s1644_s29, %s1645_s30  }
  0x12   :  { %1635 = dma.done.wait [#allocation7], 1024  }
  0x13   :  { %1636 = vsyncadd [#allocation7], 4294966272 }
  0x14   :  { %1637 = dma.done.wait [#allocation10], 2048  }
  0x15   :  { %1638 = vsyncadd [#allocation10], 4294965248 }
  0x16   :  { %1639 = dma.done.wait [#allocation13], 1024  }
  0x17   :  { %1640 = vsyncadd [#allocation13], 4294966272  ;;  %vm106_vm0 = vcmask 261120   ;;  %v1652_v0 = vmov 0.0   ;;  %v1723_v1 = vld [vmem:[#allocation11 + $0x30] sm:$0xff]  ;;  %v1725_v2 = vld [vmem:[#allocation11 + $0x38] sm:$0xff] }
  0x18   :  { %107 = vst.msk [vmem:[#allocation2] sm:$0xff] %vm106_vm0, %v1652_v0  ;;  %v1727_v3 = vld [vmem:[#allocation11 + $0x20] sm:$0xff]  ;;  %144 = vmatpush.msra.mxu0 %v1723_v1  ;;  %166 = vmatpush.msra.mxu1 %v1725_v2  ;;  %v1731_v4 = vld [vmem:[#allocation11 + $0x28] sm:$0xff]  ;;  %v1733_v5 = vld [vmem:[#allocation11 + $0x10] sm:$0xff]  ;;  %s1653_s4 = smov 32   ;;  %s1654_s22 = smov 64  }
  0x19   :  { %108 = vst.msk [vmem:[#allocation3] sm:$0xff] %vm106_vm0, %v1652_v0  ;;  %v1735_v6 = vld [vmem:[#allocation11 + $0x18] sm:$0xff]  ;;  %286 = vmatpush.msra.mxu2 %v1723_v1  ;;  %308 = vmatpush.msra.mxu3 %v1725_v2  ;;  %v1741_v7 = vld [vmem:[#allocation11] sm:$0xff]  ;;  %v1743_v9 = vld [vmem:[#allocation11 + $0x8] sm:$0xff]  ;;  %s1655_s23 = smov 96   ;;  %s1656_s26 = smov [#allocation15]  }
  0x1a   :  { %109 = vst.msk [vmem:[#allocation4] sm:$0xff] %vm106_vm0, %v1652_v0  ;;  %145 = vmatpush.msra.mxu0 %v1727_v3  ;;  %167 = vmatpush.msra.mxu1 %v1731_v4  ;;  %v123_v13 = vld [vmem:[#allocation6] sm:$0xff]  ;;  %s1284_s27 = sshll.u32 %s1656_s26, 4  ;;  %s1286_s30 = sshll.u32 %s1975_s6, 4  ;;  %s1285_s27 = int_to_ptr.vmem [resolvable:$true] %s1284_s27  ;;  %s1287_s30 = int_to_ptr.hbm [resolvable:$true] %s1286_s30 }
  0x1b   :  { %110 = vst.msk [vmem:[#allocation5] sm:$0xff] %vm106_vm0, %v1652_v0  ;;  %287 = vmatpush.msra.mxu2 %v1727_v3  ;;  %309 = vmatpush.msra.mxu3 %v1731_v4  ;;  %v124_v17 = vld [vmem:[#allocation9] sm:$0xff] }
  0x1c   :  { %146 = vmatpush.msra.mxu0 %v1733_v5  ;;  %168 = vmatpush.msra.mxu1 %v1735_v6 }
  0x1d   :  { %288 = vmatpush.msra.mxu2 %v1733_v5  ;;  %310 = vmatpush.msra.mxu3 %v1735_v6 }
  0x1e   :  { %147 = vmatpush.msra.mxu0 %v1741_v7  ;;  %169 = vmatpush.msra.mxu1 %v1743_v9 }
  0x1f   :  { %v119_v11 = vld [vmem:[#allocation2] sm:$0xff]  ;;  %289 = vmatpush.msra.mxu2 %v1741_v7  ;;  %311 = vmatpush.msra.mxu3 %v1743_v9 }
  0x20   :  { %v120_v8 = vld [vmem:[#allocation3] sm:$0xff]  ;;  %1298 = vmatmul.msk.f32.vlgmr.msra.gmra.mxu0 %vm106_vm0, %v119_v11  ;;  %1300 = vmatmul.msk.f32.vlgmr.msra.gmra.mxu1 %vm106_vm0, %v119_v11 }
  0x21   :  { %199 = vrot.lane.b32.xlu1 %v120_v8, %s1653_s4  ;;  %420 = vmatpush.msrb.mxu0 %v1723_v1  ;;  %v121_v12 = vld [vmem:[#allocation4] sm:$0xff] }
  0x22   :  { %v122_v10 = vld [vmem:[#allocation5] sm:$0xff]  ;;  %442 = vmatpush.msrb.mxu1 %v1725_v2  ;;  %554 = vmatpush.msrb.mxu2 %v1723_v1 }
  0x23   :  { %240 = vrot.lane.b32.xlu2 %v122_v10, %s1653_s4  ;;  %421 = vmatpush.msrb.mxu0 %v1727_v3 }
  0x24   :  { %443 = vmatpush.msrb.mxu1 %v1731_v4  ;;  %576 = vmatpush.msrb.mxu3 %v1725_v2 }
  0x25   :  { %422 = vmatpush.msrb.mxu0 %v1733_v5  ;;  %555 = vmatpush.msrb.mxu2 %v1727_v3 }
  0x26   :  { %444 = vmatpush.msrb.mxu1 %v1735_v6  ;;  %577 = vmatpush.msrb.mxu3 %v1731_v4 }
  0x27   :  { %423 = vmatpush.msrb.mxu0 %v1741_v7  ;;  %556 = vmatpush.msrb.mxu2 %v1733_v5 }
  0x28   :  { %1301 = vmatmul.msk.f32.gmra.mxu1 %vm106_vm0, %v121_v12  ;;  %1299 = vmatmul.msk.f32.gmra.mxu0 %vm106_vm0, %v121_v12 }
  0x29   :  { %445 = vmatpush.msrb.mxu1 %v1743_v9  ;;  %578 = vmatpush.msrb.mxu3 %v1735_v6 }
  0x2a   :  { %688 = vmatpush.msra.mxu0 %v1723_v1  ;;  %557 = vmatpush.msrb.mxu2 %v1741_v7 }
  0x2b   :  { %710 = vmatpush.msra.mxu1 %v1725_v2  ;;  %579 = vmatpush.msrb.mxu3 %v1743_v9 }
  0x2c   :  { %689 = vmatpush.msra.mxu0 %v1727_v3 }
  0x2d   :  { %711 = vmatpush.msra.mxu1 %v1731_v4 }
  0x2e   :  { %690 = vmatpush.msra.mxu0 %v1733_v5 }
  0x2f   :  { %712 = vmatpush.msra.mxu1 %v1735_v6 }
  0x30   :  { %691 = vmatpush.msra.mxu0 %v1741_v7 }
  0x31   :  { %713 = vmatpush.msra.mxu1 %v1743_v9 }
  0x7d   :  { %v241_v53 = vpop.permute.xlu2 %240 }
  0x93   :  { %v200_v57 = vpop.permute.xlu1 %199 }
  0x9d   :  { %v149_v14 = vpop.f32.mrf.mxu0  ;;  %v171_v15 = vpop.f32.mrf.mxu1 }
  0x9e   :  { %v176_v16 = vadd.f32 %v149_v14, %v123_v13  ;;  %v261_v13 = vld [vmem:[#allocation6 + $0x8] sm:$0xff] }
  0xa0   :  { %1363 = vtanh.f32 %v176_v16  ;;  %v1302_v23 = vmul.f32 -1.442695, %v176_v16 }
  0xa5   :  { %v173_v18 = vpop.f32.mrf.mxu1  ;;  %v152_v19 = vpop.f32.mrf.mxu0 }
  0xa6   :  { %v1364_v20 = vpop.eup %1363  ;;  %v177_v21 = vadd.f32 %v173_v18, %v124_v17  ;;  %v263_v17 = vld [vmem:[#allocation9 + $0x8] sm:$0xff] }
  0xa7   :  { %204 = vrot.lane.b32.xlu0 %v1364_v20, %s1654_s22 }
  0xa8   :  { %1365 = vtanh.f32 %v177_v21  ;;  %v1303_v24 = vmul.f32 -1.442695, %v177_v21 }
  0xa9   :  { %1367 = vpow2.f32 %v1302_v23 }
  0xaa   :  { %1369 = vpow2.f32 %v1303_v24 }
  0xae   :  { %v1366_v22 = vpop.eup %1365 }
  0xaf   :  { %245 = vrot.lane.b32.xlu0 %v1366_v22, %s1654_s22  ;;  %v1368_v25 = vpop.eup %1367 }
  0xb0   :  { %v181_v26 = vadd.f32 1.0, %v1368_v25  ;;  %v1370_v27 = vpop.eup %1369 }
  0xb1   :  { %v222_v28 = vadd.f32 1.0, %v1370_v27 }
  0xb2   :  { %1371 = vrcp.f32 %v181_v26  ;;  %v193_v37 = vand.u32 2147483648, %v181_v26  ;;  %vm187_vm2 = vweird.f32 %v181_v26  ;;  %v191_v38 = vand.u32 2147483647, %v181_v26 }
  0xb3   :  { %1373 = vrcp.f32 %v222_v28  ;;  %vm228_vm5 = vweird.f32 %v222_v28  ;;  %v234_v43 = vand.u32 2147483648, %v222_v28  ;;  %v232_v46 = vand.u32 2147483647, %v222_v28 }
  0xb4   :  { %v194_v41 = vor.u32 1.1754944e-38, %v193_v37  ;;  %vm192_vm4 = vcmp.eq.f32.partialorder %v191_v38, 8.507059e+37 }
  0xb5   :  { %v235_v48 = vor.u32 1.1754944e-38, %v234_v43  ;;  %vm233_vm8 = vcmp.eq.f32.partialorder %v232_v46, 8.507059e+37 }
  0xb8   :  { %v1372_v29 = vpop.eup %1371 }
  0xb9   :  { %v183_v30 = vmul.f32 %v1372_v29, %v181_v26  ;;  %v1374_v32 = vpop.eup %1373  ;;  %vm188_vm1 = vweird.f32 %v1372_v29 }
  0xba   :  { %v224_v34 = vmul.f32 %v1374_v32, %v222_v28  ;;  %vm189_vm3 = vmor %vm187_vm2, %vm188_vm1  ;;  %vm229_vm6 = vweird.f32 %v1374_v32 }
  0xbb   :  { %v184_v31 = vsub.f32 1.0, %v183_v30  ;;  %vm230_vm7 = vmor %vm228_vm5, %vm229_vm6 }
  0xbc   :  { %v225_v36 = vsub.f32 1.0, %v224_v34 }
  0xbd   :  { %v185_v33 = vmul.f32 %v1372_v29, %v184_v31 }
  0xbe   :  { %v226_v40 = vmul.f32 %v1374_v32, %v225_v36 }
  0xbf   :  { %v186_v35 = vadd.f32 %v1372_v29, %v185_v33 }
  0xc0   :  { %v227_v45 = vadd.f32 %v1374_v32, %v226_v40 }
  0xc1   :  { %v190_v39 = vsel %vm189_vm3, %v1372_v29, %v186_v35 }
  0xc2   :  { %v195_v42 = vsel %vm192_vm4, %v194_v41, %v190_v39  ;;  %v231_v49 = vsel %vm230_vm7, %v1374_v32, %v227_v45 }
  0xc3   :  { %v236_v50 = vsel %vm233_vm8, %v235_v48, %v231_v49  ;;  %v202_v59 = vmul.f32 %v200_v57, %v195_v42 }
  0xc4   :  { %v243_v54 = vmul.f32 %v241_v53, %v236_v50 }
 0x119   :  { %v205_v44 = vpop.permute.xlu0 %204 }
 0x11a   :  { %v207_v47 = vmul.f32 %v205_v44, %v195_v42 }
 0x11c   :  { %209 = vrot.lane.b32.xlu1 %v207_v47, %s1653_s4 }
 0x121   :  { %v246_v51 = vpop.permute.xlu0 %245 }
 0x122   :  { %v248_v52 = vmul.f32 %v246_v51, %v236_v50 }
 0x124   :  { %250 = vrot.lane.b32.xlu2 %v248_v52, %s1653_s4 }
 0x17e   :  { %v251_v55 = vpop.permute.xlu2 %250 }
 0x17f   :  { %v1789_v56 = vadd.f32 %v251_v55, %v243_v54 }
 0x181   :  { %1375 = vtanh.f32 %v1789_v56 }
 0x187   :  { %v1376_v58 = vpop.eup %1375 }
 0x188   :  { %256 = vrot.lane.b32.xlu1 %v1376_v58, %s1654_s22 }
 0x18e   :  { %v210_v60 = vpop.permute.xlu1 %209 }
 0x18f   :  { %v1793_v61 = vadd.f32 %v210_v60, %v202_v59 }
 0x191   :  { %1377 = vtanh.f32 %v1793_v61 }
 0x197   :  { %v1378_v62 = vpop.eup %1377 }
 0x198   :  { %215 = vrot.lane.b32.xlu0 %v1378_v62, %s1654_s22 }
 0x1fa   :  { %v257_v63 = vpop.permute.xlu1 %256 }
 0x1fb   :  { %v259_v0 = vmul.f32 %v257_v63, %v236_v50 }
 0x1fd   :  { %268 = vrot.lane.b32.xlu0 %v259_v0, %s1653_s4 }
 0x20a   :  { %v216_v8 = vpop.permute.xlu0 %215 }
 0x20b   :  { %v218_v10 = vmul.f32 %v216_v8, %v195_v42 }
 0x20d   :  { %266 = vrot.lane.b32.xlu2 %v218_v10, %s1653_s4 }
 0x267   :  { %v267_v11 = vpop.permute.xlu2 %266 }
 0x268   :  { %1304 = vmatmul.msk.f32.vlgmr.msra.gmra.mxu2 %vm106_vm0, %v267_v11  ;;  %1306 = vmatmul.msk.f32.vlgmr.msra.gmra.mxu3 %vm106_vm0, %v267_v11  ;;  %v395_v11 = vld [vmem:[#allocation6 + $0x10] sm:$0xff] }
 0x269   :  { %822 = vmatpush.msra.mxu2 %v1723_v1  ;;  %844 = vmatpush.msra.mxu3 %v1725_v2 }
 0x26b   :  { %823 = vmatpush.msra.mxu2 %v1727_v3  ;;  %845 = vmatpush.msra.mxu3 %v1731_v4 }
 0x26d   :  { %824 = vmatpush.msra.mxu2 %v1733_v5  ;;  %846 = vmatpush.msra.mxu3 %v1735_v6 }
 0x26f   :  { %v269_v12 = vpop.permute.xlu0 %268  ;;  %825 = vmatpush.msra.mxu2 %v1741_v7  ;;  %847 = vmatpush.msra.mxu3 %v1743_v9 }
 0x270   :  { %1305 = vmatmul.msk.f32.gmra.mxu2 %vm106_vm0, %v269_v12  ;;  %1307 = vmatmul.msk.f32.gmra.mxu3 %vm106_vm0, %v269_v12 }
 0x2eb   :  { %v291_v14 = vpop.f32.mrf.mxu2  ;;  %v313_v15 = vpop.f32.mrf.mxu3 }
 0x2ec   :  { %v318_v16 = vadd.f32 %v291_v14, %v261_v13  ;;  %v397_v15 = vld [vmem:[#allocation9 + $0x10] sm:$0xff] }
 0x2ee   :  { %1379 = vtanh.f32 %v318_v16  ;;  %v1308_v26 = vmul.f32 -1.442695, %v318_v16 }
 0x2f3   :  { %v294_v18 = vpop.f32.mrf.mxu2  ;;  %v315_v19 = vpop.f32.mrf.mxu3 }
 0x2f4   :  { %v1380_v20 = vpop.eup %1379  ;;  %v319_v21 = vadd.f32 %v315_v19, %v263_v17 }
 0x2f5   :  { %342 = vrot.lane.b32.xlu1 %v1380_v20, %s1654_s22 }
 0x2f6   :  { %1381 = vtanh.f32 %v319_v21  ;;  %v1309_v23 = vmul.f32 -1.442695, %v319_v21 }
 0x2f8   :  { %1383 = vpow2.f32 %v1309_v23 }
 0x2fc   :  { %v1382_v22 = vpop.eup %1381 }
 0x2fd   :  { %379 = vrot.lane.b32.xlu2 %v1382_v22, %s1654_s22 }
 0x2fe   :  { %v1384_v24 = vpop.eup %1383 }
 0x2ff   :  { %v360_v25 = vadd.f32 1.0, %v1384_v24 }
 0x301   :  { %1385 = vrcp.f32 %v360_v25  ;;  %v372_v35 = vand.u32 2147483648, %v360_v25  ;;  %vm366_vm10 = vweird.f32 %v360_v25  ;;  %v370_v36 = vand.u32 2147483647, %v360_v25 }
 0x302   :  { %1387 = vpow2.f32 %v1308_v26 }
 0x303   :  { %v373_v39 = vor.u32 1.1754944e-38, %v372_v35  ;;  %vm371_vm12 = vcmp.eq.f32.partialorder %v370_v36, 8.507059e+37 }
 0x307   :  { %v1386_v27 = vpop.eup %1385 }
 0x308   :  { %v1388_v28 = vpop.eup %1387  ;;  %v362_v29 = vmul.f32 %v1386_v27, %v360_v25  ;;  %vm367_vm9 = vweird.f32 %v1386_v27 }
 0x309   :  { %v323_v30 = vadd.f32 1.0, %v1388_v28  ;;  %vm368_vm11 = vmor %vm366_vm10, %vm367_vm9 }
 0x30a   :  { %v363_v31 = vsub.f32 1.0, %v362_v29 }
 0x30b   :  { %1389 = vrcp.f32 %v323_v30  ;;  %v335_v46 = vand.u32 2147483648, %v323_v30  ;;  %vm329_vm14 = vweird.f32 %v323_v30  ;;  %v333_v47 = vand.u32 2147483647, %v323_v30 }
 0x30c   :  { %v364_v32 = vmul.f32 %v1386_v27, %v363_v31 }
 0x30d   :  { %v336_v49 = vor.u32 1.1754944e-38, %v335_v46  ;;  %vm334_vm1 = vcmp.eq.f32.partialorder %v333_v47, 8.507059e+37 }
 0x30e   :  { %v365_v33 = vadd.f32 %v1386_v27, %v364_v32 }
 0x310   :  { %v369_v37 = vsel %vm368_vm11, %v1386_v27, %v365_v33 }
 0x311   :  { %v1390_v34 = vpop.eup %1389  ;;  %v374_v41 = vsel %vm371_vm12, %v373_v39, %v369_v37 }
 0x312   :  { %v325_v38 = vmul.f32 %v1390_v34, %v323_v30  ;;  %vm330_vm13 = vweird.f32 %v1390_v34  ;;  %v377_v53 = vmul.f32 %v374_v41, %v1789_v56 }
 0x313   :  { %vm331_vm15 = vmor %vm329_vm14, %vm330_vm13 }
 0x314   :  { %v326_v43 = vsub.f32 1.0, %v325_v38 }
 0x316   :  { %v327_v44 = vmul.f32 %v1390_v34, %v326_v43 }
 0x318   :  { %v328_v45 = vadd.f32 %v1390_v34, %v327_v44 }
 0x31a   :  { %v332_v48 = vsel %vm331_vm15, %v1390_v34, %v328_v45 }
 0x31b   :  { %v337_v51 = vsel %vm334_vm1, %v336_v49, %v332_v48 }
 0x31c   :  { %v340_v58 = vmul.f32 %v337_v51, %v1793_v61 }
 0x357   :  { %v380_v40 = vpop.permute.xlu2 %379 }
 0x358   :  { %v382_v42 = vmul.f32 %v380_v40, %v374_v41 }
 0x35a   :  { %384 = vrot.lane.b32.xlu1 %v382_v42, %s1653_s4 }
 0x367   :  { %v343_v50 = vpop.permute.xlu1 %342 }
 0x368   :  { %v345_v52 = vmul.f32 %v343_v50, %v337_v51 }
 0x36a   :  { %347 = vrot.lane.b32.xlu0 %v345_v52, %s1653_s4 }
 0x3cc   :  { %v385_v54 = vpop.permute.xlu1 %384 }
 0x3cd   :  { %v1816_v55 = vadd.f32 %v385_v54, %v377_v53 }
 0x3cf   :  { %1391 = vtanh.f32 %v1816_v55 }
 0x3d5   :  { %v1392_v57 = vpop.eup %1391 }
 0x3d6   :  { %390 = vrot.lane.b32.xlu0 %v1392_v57, %s1654_s22 }
 0x3dc   :  { %v348_v59 = vpop.permute.xlu0 %347 }
 0x3dd   :  { %v1821_v60 = vadd.f32 %v348_v59, %v340_v58 }
 0x3df   :  { %1393 = vtanh.f32 %v1821_v60 }
 0x3e5   :  { %v1394_v62 = vpop.eup %1393 }
 0x3e6   :  { %353 = vrot.lane.b32.xlu2 %v1394_v62, %s1654_s22 }
 0x440   :  { %v354_v63 = vpop.permute.xlu2 %353 }
 0x441   :  { %v356_v56 = vmul.f32 %v354_v63, %v337_v51 }
 0x443   :  { %400 = vrot.lane.b32.xlu1 %v356_v56, %s1653_s4 }
 0x448   :  { %v391_v0 = vpop.permute.xlu0 %390 }
 0x449   :  { %v393_v8 = vmul.f32 %v391_v0, %v374_v41 }
 0x44b   :  { %402 = vrot.lane.b32.xlu2 %v393_v8, %s1653_s4 }
 0x4a5   :  { %v403_v61 = vpop.permute.xlu2 %402 }
 0x4b5   :  { %v401_v10 = vpop.permute.xlu1 %400 }
 0x4b6   :  { %1310 = vmatmul.msk.f32.vlgmr.msrb.gmra.mxu0 %vm106_vm0, %v401_v10  ;;  %1312 = vmatmul.msk.f32.vlgmr.msrb.gmra.mxu1 %vm106_vm0, %v401_v10 }
 0x4b7   :  { %978 = vmatpush.msrb.mxu1 %v1725_v2  ;;  %956 = vmatpush.msrb.mxu0 %v1723_v1 }
 0x4b9   :  { %979 = vmatpush.msrb.mxu1 %v1731_v4  ;;  %957 = vmatpush.msrb.mxu0 %v1727_v3 }
 0x4bb   :  { %980 = vmatpush.msrb.mxu1 %v1735_v6  ;;  %958 = vmatpush.msrb.mxu0 %v1733_v5 }
 0x4bd   :  { %981 = vmatpush.msrb.mxu1 %v1743_v9  ;;  %959 = vmatpush.msrb.mxu0 %v1741_v7 }
 0x4be   :  { %1311 = vmatmul.msk.f32.gmra.mxu0 %vm106_vm0, %v403_v61  ;;  %1313 = vmatmul.msk.f32.gmra.mxu1 %vm106_vm0, %v403_v61 }
 0x533   :  { %v425_v12 = vpop.f32.mrf.mxu0  ;;  %v447_v13 = vpop.f32.mrf.mxu1 }
 0x534   :  { %v452_v14 = vadd.f32 %v425_v12, %v395_v11 }
 0x536   :  { %1395 = vtanh.f32 %v452_v14  ;;  %v1314_v21 = vmul.f32 -1.442695, %v452_v14 }
 0x53b   :  { %v428_v16 = vpop.f32.mrf.mxu0  ;;  %v449_v17 = vpop.f32.mrf.mxu1 }
 0x53c   :  { %v1396_v18 = vpop.eup %1395  ;;  %v453_v19 = vadd.f32 %v449_v17, %v397_v15 }
 0x53d   :  { %476 = vrot.lane.b32.xlu0 %v1396_v18, %s1654_s22 }
 0x53e   :  { %1397 = vtanh.f32 %v453_v19  ;;  %v1315_v22 = vmul.f32 -1.442695, %v453_v19 }
 0x53f   :  { %1399 = vpow2.f32 %v1314_v21 }
 0x540   :  { %1401 = vpow2.f32 %v1315_v22 }
 0x544   :  { %v1398_v20 = vpop.eup %1397 }
 0x545   :  { %513 = vrot.lane.b32.xlu1 %v1398_v20, %s1654_s22  ;;  %v1400_v23 = vpop.eup %1399 }
 0x546   :  { %v457_v24 = vadd.f32 1.0, %v1400_v23  ;;  %v1402_v25 = vpop.eup %1401 }
 0x547   :  { %v494_v26 = vadd.f32 1.0, %v1402_v25 }
 0x548   :  { %1403 = vrcp.f32 %v457_v24  ;;  %v469_v35 = vand.u32 2147483648, %v457_v24  ;;  %vm463_vm3 = vweird.f32 %v457_v24  ;;  %v467_v36 = vand.u32 2147483647, %v457_v24 }
 0x549   :  { %1405 = vrcp.f32 %v494_v26  ;;  %v506_v44 = vand.u32 2147483648, %v494_v26  ;;  %vm500_vm7 = vweird.f32 %v494_v26  ;;  %v504_v45 = vand.u32 2147483647, %v494_v26 }
 0x54a   :  { %v470_v39 = vor.u32 1.1754944e-38, %v469_v35  ;;  %vm468_vm5 = vcmp.eq.f32.partialorder %v467_v36, 8.507059e+37 }
 0x54b   :  { %v507_v47 = vor.u32 1.1754944e-38, %v506_v44  ;;  %vm505_vm9 = vcmp.eq.f32.partialorder %v504_v45, 8.507059e+37 }
 0x54e   :  { %v1404_v27 = vpop.eup %1403 }
 0x54f   :  { %v459_v28 = vmul.f32 %v1404_v27, %v457_v24  ;;  %v1406_v30 = vpop.eup %1405  ;;  %vm464_vm2 = vweird.f32 %v1404_v27 }
 0x550   :  { %v496_v32 = vmul.f32 %v1406_v30, %v494_v26  ;;  %vm465_vm4 = vmor %vm463_vm3, %vm464_vm2  ;;  %vm501_vm6 = vweird.f32 %v1406_v30 }
 0x551   :  { %v460_v29 = vsub.f32 1.0, %v459_v28  ;;  %vm502_vm8 = vmor %vm500_vm7, %vm501_vm6 }
 0x552   :  { %v497_v34 = vsub.f32 1.0, %v496_v32 }
 0x553   :  { %v461_v31 = vmul.f32 %v1404_v27, %v460_v29 }
 0x554   :  { %v498_v38 = vmul.f32 %v1406_v30, %v497_v34 }
 0x555   :  { %v462_v33 = vadd.f32 %v1404_v27, %v461_v31 }
 0x556   :  { %v499_v43 = vadd.f32 %v1406_v30, %v498_v38 }
 0x557   :  { %v466_v37 = vsel %vm465_vm4, %v1404_v27, %v462_v33 }
 0x558   :  { %v471_v41 = vsel %vm468_vm5, %v470_v39, %v466_v37  ;;  %v503_v46 = vsel %vm502_vm8, %v1406_v30, %v499_v43 }
 0x559   :  { %v508_v49 = vsel %vm505_vm9, %v507_v47, %v503_v46  ;;  %v474_v51 = vmul.f32 %v471_v41, %v1821_v60 }
 0x55a   :  { %v511_v57 = vmul.f32 %v508_v49, %v1816_v55 }
 0x5af   :  { %v477_v40 = vpop.permute.xlu0 %476 }
 0x5b0   :  { %v479_v42 = vmul.f32 %v477_v40, %v471_v41 }
 0x5b2   :  { %481 = vrot.lane.b32.xlu2 %v479_v42, %s1653_s4 }
 0x5b7   :  { %v514_v48 = vpop.permute.xlu1 %513 }
 0x5b8   :  { %v516_v50 = vmul.f32 %v514_v48, %v508_v49 }
 0x5ba   :  { %518 = vrot.lane.b32.xlu0 %v516_v50, %s1653_s4 }
 0x60c   :  { %v482_v52 = vpop.permute.xlu2 %481 }
 0x60d   :  { %v1844_v53 = vadd.f32 %v482_v52, %v474_v51 }
 0x60f   :  { %1407 = vtanh.f32 %v1844_v53 }
 0x615   :  { %v1408_v54 = vpop.eup %1407 }
 0x616   :  { %487 = vrot.lane.b32.xlu1 %v1408_v54, %s1654_s22 }
 0x62c   :  { %v519_v58 = vpop.permute.xlu0 %518 }
 0x62d   :  { %v1849_v59 = vadd.f32 %v519_v58, %v511_v57  ;;  %v663_v57 = vld [vmem:[#allocation6 + $0x20] sm:$0xff] }
 0x62f   :  { %1409 = vtanh.f32 %v1849_v59 }
 0x635   :  { %v1410_v62 = vpop.eup %1409 }
 0x636   :  { %524 = vrot.lane.b32.xlu2 %v1410_v62, %s1654_s22 }
 0x688   :  { %v488_v63 = vpop.permute.xlu1 %487 }
 0x689   :  { %v490_v60 = vmul.f32 %v488_v63, %v471_v41 }
 0x68b   :  { %534 = vrot.lane.b32.xlu0 %v490_v60, %s1653_s4  ;;  %v665_v60 = vld [vmem:[#allocation9 + $0x20] sm:$0xff] }
 0x690   :  { %v525_v56 = vpop.permute.xlu2 %524 }
 0x691   :  { %v527_v0 = vmul.f32 %v525_v56, %v508_v49 }
 0x693   :  { %536 = vrot.lane.b32.xlu1 %v527_v0, %s1653_s4 }
 0x6fd   :  { %v535_v8 = vpop.permute.xlu0 %534 }
 0x6fe   :  { %1316 = vmatmul.msk.f32.vlgmr.msrb.gmra.mxu2 %vm106_vm0, %v535_v8  ;;  %1318 = vmatmul.msk.f32.vlgmr.msrb.gmra.mxu3 %vm106_vm0, %v535_v8 }
 0x6ff   :  { %1090 = vmatpush.msrb.mxu2 %v1723_v1  ;;  %1112 = vmatpush.msrb.mxu3 %v1725_v2  ;;  %v529_v1 = vld [vmem:[#allocation6 + $0x18] sm:$0xff] }
 0x701   :  { %1091 = vmatpush.msrb.mxu2 %v1727_v3  ;;  %1113 = vmatpush.msrb.mxu3 %v1731_v4  ;;  %v531_v3 = vld [vmem:[#allocation9 + $0x18] sm:$0xff] }
 0x703   :  { %1092 = vmatpush.msrb.mxu2 %v1733_v5  ;;  %1114 = vmatpush.msrb.mxu3 %v1735_v6 }
 0x705   :  { %v537_v55 = vpop.permute.xlu1 %536  ;;  %1093 = vmatpush.msrb.mxu2 %v1741_v7  ;;  %1115 = vmatpush.msrb.mxu3 %v1743_v9 }
 0x706   :  { %1317 = vmatmul.msk.f32.gmra.mxu2 %vm106_vm0, %v537_v55  ;;  %1319 = vmatmul.msk.f32.gmra.mxu3 %vm106_vm0, %v537_v55 }
 0x781   :  { %v559_v10 = vpop.f32.mrf.mxu2  ;;  %v581_v2 = vpop.f32.mrf.mxu3 }
 0x782   :  { %v586_v61 = vadd.f32 %v559_v10, %v529_v1 }
 0x784   :  { %1411 = vtanh.f32 %v586_v61  ;;  %v1320_v7 = vmul.f32 -1.442695, %v586_v61 }
 0x789   :  { %v562_v4 = vpop.f32.mrf.mxu2  ;;  %v583_v11 = vpop.f32.mrf.mxu3 }
 0x78a   :  { %v1412_v5 = vpop.eup %1411  ;;  %v587_v12 = vadd.f32 %v583_v11, %v531_v3 }
 0x78b   :  { %610 = vrot.lane.b32.xlu2 %v1412_v5, %s1654_s22 }
 0x78c   :  { %1413 = vtanh.f32 %v587_v12  ;;  %v1321_v17 = vmul.f32 -1.442695, %v587_v12 }
 0x78d   :  { %1415 = vpow2.f32 %v1320_v7 }
 0x792   :  { %v1414_v6 = vpop.eup %1413 }
 0x793   :  { %647 = vrot.lane.b32.xlu0 %v1414_v6, %s1654_s22  ;;  %v1416_v9 = vpop.eup %1415 }
 0x794   :  { %v591_v13 = vadd.f32 1.0, %v1416_v9 }
 0x796   :  { %1417 = vrcp.f32 %v591_v13  ;;  %v603_v20 = vand.u32 2147483648, %v591_v13  ;;  %vm597_vm11 = vweird.f32 %v591_v13  ;;  %v601_v21 = vand.u32 2147483647, %v591_v13 }
 0x797   :  { %1419 = vpow2.f32 %v1321_v17 }
 0x798   :  { %v604_v24 = vor.u32 1.1754944e-38, %v603_v20  ;;  %vm602_vm13 = vcmp.eq.f32.partialorder %v601_v21, 8.507059e+37 }
 0x79c   :  { %v1418_v14 = vpop.eup %1417 }
 0x79d   :  { %v593_v15 = vmul.f32 %v1418_v14, %v591_v13  ;;  %vm598_vm10 = vweird.f32 %v1418_v14  ;;  %v1420_v22 = vpop.eup %1419 }
 0x79e   :  { %vm599_vm12 = vmor %vm597_vm11, %vm598_vm10  ;;  %v628_v25 = vadd.f32 1.0, %v1420_v22 }
 0x79f   :  { %v594_v16 = vsub.f32 1.0, %v593_v15 }
 0x7a0   :  { %1421 = vrcp.f32 %v628_v25  ;;  %v640_v34 = vand.u32 2147483648, %v628_v25  ;;  %vm634_vm15 = vweird.f32 %v628_v25  ;;  %v638_v35 = vand.u32 2147483647, %v628_v25 }
 0x7a1   :  { %v595_v18 = vmul.f32 %v1418_v14, %v594_v16 }
 0x7a2   :  { %v641_v37 = vor.u32 1.1754944e-38, %v640_v34  ;;  %vm639_vm2 = vcmp.eq.f32.partialorder %v638_v35, 8.507059e+37 }
 0x7a3   :  { %v596_v19 = vadd.f32 %v1418_v14, %v595_v18 }
 0x7a5   :  { %v600_v23 = vsel %vm599_vm12, %v1418_v14, %v596_v19 }
 0x7a6   :  { %v605_v27 = vsel %vm602_vm13, %v604_v24, %v600_v23  ;;  %v1422_v29 = vpop.eup %1421 }
 0x7a7   :  { %v630_v30 = vmul.f32 %v1422_v29, %v628_v25  ;;  %vm635_vm14 = vweird.f32 %v1422_v29  ;;  %v608_v41 = vmul.f32 %v605_v27, %v1844_v53 }
 0x7a8   :  { %vm636_vm1 = vmor %vm634_vm15, %vm635_vm14 }
 0x7a9   :  { %v631_v31 = vsub.f32 1.0, %v630_v30 }
 0x7ab   :  { %v632_v32 = vmul.f32 %v1422_v29, %v631_v31 }
 0x7ad   :  { %v633_v33 = vadd.f32 %v1422_v29, %v632_v32 }
 0x7af   :  { %v637_v36 = vsel %vm636_vm1, %v1422_v29, %v633_v33 }
 0x7b0   :  { %v642_v39 = vsel %vm639_vm2, %v641_v37, %v637_v36 }
 0x7b1   :  { %v645_v44 = vmul.f32 %v642_v39, %v1849_v59 }
 0x7e5   :  { %v611_v26 = vpop.permute.xlu2 %610 }
 0x7e6   :  { %v613_v28 = vmul.f32 %v611_v26, %v605_v27 }
 0x7e8   :  { %615 = vrot.lane.b32.xlu1 %v613_v28, %s1653_s4 }
 0x805   :  { %v648_v38 = vpop.permute.xlu0 %647 }
 0x806   :  { %v650_v40 = vmul.f32 %v648_v38, %v642_v39 }
 0x808   :  { %652 = vrot.lane.b32.xlu2 %v650_v40, %s1653_s4 }
 0x85a   :  { %v616_v42 = vpop.permute.xlu1 %615 }
 0x85b   :  { %v1872_v43 = vadd.f32 %v616_v42, %v608_v41 }
 0x85d   :  { %1423 = vtanh.f32 %v1872_v43 }
 0x862   :  { %v653_v45 = vpop.permute.xlu2 %652 }
 0x863   :  { %v1424_v46 = vpop.eup %1423  ;;  %v1876_v47 = vadd.f32 %v653_v45, %v645_v44  ;;  %v797_v45 = vld [vmem:[#allocation6 + $0x28] sm:$0xff] }
 0x864   :  { %621 = vrot.lane.b32.xlu0 %v1424_v46, %s1654_s22 }
 0x865   :  { %1425 = vtanh.f32 %v1876_v47 }
 0x86b   :  { %v1426_v48 = vpop.eup %1425 }
 0x86c   :  { %658 = vrot.lane.b32.xlu1 %v1426_v48, %s1654_s22 }
 0x8d6   :  { %v622_v49 = vpop.permute.xlu0 %621 }
 0x8d7   :  { %v624_v50 = vmul.f32 %v622_v49, %v605_v27  ;;  %v799_v49 = vld [vmem:[#allocation9 + $0x28] sm:$0xff] }
 0x8d9   :  { %668 = vrot.lane.b32.xlu2 %v624_v50, %s1653_s4 }
 0x8de   :  { %v659_v51 = vpop.permute.xlu1 %658 }
 0x8df   :  { %v661_v52 = vmul.f32 %v659_v51, %v642_v39 }
 0x8e1   :  { %670 = vrot.lane.b32.xlu0 %v661_v52, %s1653_s4 }
 0x933   :  { %v669_v53 = vpop.permute.xlu2 %668 }
 0x934   :  { %1322 = vmatmul.msk.f32.vlgmr.msra.gmra.mxu0 %vm106_vm0, %v669_v53  ;;  %1324 = vmatmul.msk.f32.vlgmr.msra.gmra.mxu1 %vm106_vm0, %v669_v53 }
 0x953   :  { %v671_v54 = vpop.permute.xlu0 %670 }
 0x954   :  { %1323 = vmatmul.msk.f32.gmra.mxu0 %vm106_vm0, %v671_v54  ;;  %1325 = vmatmul.msk.f32.gmra.mxu1 %vm106_vm0, %v671_v54 }
 0x9b1   :  { %v693_v58 = vpop.f32.mrf.mxu0  ;;  %v715_v59 = vpop.f32.mrf.mxu1 }
 0x9b2   :  { %v720_v62 = vadd.f32 %v693_v58, %v663_v57 }
 0x9b4   :  { %1427 = vtanh.f32 %v720_v62  ;;  %v1326_v1 = vmul.f32 -1.442695, %v720_v62 }
 0x9ba   :  { %v1428_v63 = vpop.eup %1427 }
 0x9bb   :  { %744 = vrot.lane.b32.xlu1 %v1428_v63, %s1654_s22 }
 0x9d1   :  { %v696_v56 = vpop.f32.mrf.mxu0  ;;  %v717_v0 = vpop.f32.mrf.mxu1 }
 0x9d2   :  { %v721_v8 = vadd.f32 %v717_v0, %v665_v60 }
 0x9d4   :  { %1429 = vtanh.f32 %v721_v8  ;;  %v1327_v10 = vmul.f32 -1.442695, %v721_v8 }
 0x9d5   :  { %1431 = vpow2.f32 %v1326_v1 }
 0x9d6   :  { %1433 = vpow2.f32 %v1327_v10 }
 0x9da   :  { %v1430_v55 = vpop.eup %1429 }
 0x9db   :  { %781 = vrot.lane.b32.xlu2 %v1430_v55, %s1654_s22  ;;  %v1432_v2 = vpop.eup %1431 }
 0x9dc   :  { %v725_v61 = vadd.f32 1.0, %v1432_v2  ;;  %v1434_v3 = vpop.eup %1433 }
 0x9dd   :  { %v762_v4 = vadd.f32 1.0, %v1434_v3 }
 0x9de   :  { %1435 = vrcp.f32 %v725_v61  ;;  %v737_v15 = vand.u32 2147483648, %v725_v61  ;;  %vm731_vm4 = vweird.f32 %v725_v61  ;;  %v735_v16 = vand.u32 2147483647, %v725_v61 }
 0x9df   :  { %1437 = vrcp.f32 %v762_v4  ;;  %v774_v24 = vand.u32 2147483648, %v762_v4  ;;  %vm768_vm8 = vweird.f32 %v762_v4  ;;  %v772_v25 = vand.u32 2147483647, %v762_v4 }
 0x9e0   :  { %v738_v19 = vor.u32 1.1754944e-38, %v737_v15  ;;  %vm736_vm6 = vcmp.eq.f32.partialorder %v735_v16, 8.507059e+37 }
 0x9e1   :  { %v775_v27 = vor.u32 1.1754944e-38, %v774_v24  ;;  %vm773_vm10 = vcmp.eq.f32.partialorder %v772_v25, 8.507059e+37 }
 0x9e4   :  { %v1436_v11 = vpop.eup %1435 }
 0x9e5   :  { %v727_v5 = vmul.f32 %v1436_v11, %v725_v61  ;;  %v1438_v6 = vpop.eup %1437  ;;  %vm732_vm3 = vweird.f32 %v1436_v11 }
 0x9e6   :  { %v764_v9 = vmul.f32 %v1438_v6, %v762_v4  ;;  %vm733_vm5 = vmor %vm731_vm4, %vm732_vm3  ;;  %vm769_vm7 = vweird.f32 %v1438_v6 }
 0x9e7   :  { %v728_v12 = vsub.f32 1.0, %v727_v5  ;;  %vm770_vm9 = vmor %vm768_vm8, %vm769_vm7 }
 0x9e8   :  { %v765_v14 = vsub.f32 1.0, %v764_v9 }
 0x9e9   :  { %v729_v7 = vmul.f32 %v1436_v11, %v728_v12 }
 0x9ea   :  { %v766_v18 = vmul.f32 %v1438_v6, %v765_v14 }
 0x9eb   :  { %v730_v13 = vadd.f32 %v1436_v11, %v729_v7 }
 0x9ec   :  { %v767_v23 = vadd.f32 %v1438_v6, %v766_v18 }
 0x9ed   :  { %v734_v17 = vsel %vm733_vm5, %v1436_v11, %v730_v13 }
 0x9ee   :  { %v739_v21 = vsel %vm736_vm6, %v738_v19, %v734_v17  ;;  %v771_v26 = vsel %vm770_vm9, %v1438_v6, %v767_v23 }
 0x9ef   :  { %v776_v29 = vsel %vm773_vm10, %v775_v27, %v771_v26  ;;  %v742_v31 = vmul.f32 %v739_v21, %v1872_v43 }
 0x9f0   :  { %v779_v34 = vmul.f32 %v776_v29, %v1876_v47 }
 0xa2d   :  { %v745_v20 = vpop.permute.xlu1 %744 }
 0xa2e   :  { %v747_v22 = vmul.f32 %v745_v20, %v739_v21 }
 0xa30   :  { %749 = vrot.lane.b32.xlu0 %v747_v22, %s1653_s4 }
 0xa35   :  { %v782_v28 = vpop.permute.xlu2 %781 }
 0xa36   :  { %v784_v30 = vmul.f32 %v782_v28, %v776_v29 }
 0xa38   :  { %786 = vrot.lane.b32.xlu1 %v784_v30, %s1653_s4 }
 0xaa2   :  { %v750_v32 = vpop.permute.xlu0 %749 }
 0xaa3   :  { %v1892_v33 = vadd.f32 %v750_v32, %v742_v31 }
 0xaa5   :  { %1439 = vtanh.f32 %v1892_v33 }
 0xaaa   :  { %v787_v35 = vpop.permute.xlu1 %786 }
 0xaab   :  { %v1440_v36 = vpop.eup %1439  ;;  %v1896_v37 = vadd.f32 %v787_v35, %v779_v34  ;;  %v931_v35 = vld [vmem:[#allocation6 + $0x30] sm:$0xff] }
 0xaac   :  { %755 = vrot.lane.b32.xlu2 %v1440_v36, %s1654_s22 }
 0xaad   :  { %1441 = vtanh.f32 %v1896_v37 }
 0xab3   :  { %v1442_v38 = vpop.eup %1441 }
 0xab4   :  { %792 = vrot.lane.b32.xlu0 %v1442_v38, %s1654_s22 }
 0xb06   :  { %v756_v39 = vpop.permute.xlu2 %755 }
 0xb07   :  { %v758_v40 = vmul.f32 %v756_v39, %v739_v21  ;;  %v933_v39 = vld [vmem:[#allocation9 + $0x30] sm:$0xff] }
 0xb09   :  { %802 = vrot.lane.b32.xlu1 %v758_v40, %s1653_s4 }
 0xb26   :  { %v793_v41 = vpop.permute.xlu0 %792 }
 0xb27   :  { %v795_v42 = vmul.f32 %v793_v41, %v776_v29 }
 0xb29   :  { %804 = vrot.lane.b32.xlu2 %v795_v42, %s1653_s4 }
 0xb7b   :  { %v803_v43 = vpop.permute.xlu1 %802 }
 0xb7c   :  { %1328 = vmatmul.msk.f32.vlgmr.msra.gmra.mxu2 %vm106_vm0, %v803_v43  ;;  %1330 = vmatmul.msk.f32.vlgmr.msra.gmra.mxu3 %vm106_vm0, %v803_v43 }
 0xb83   :  { %v805_v44 = vpop.permute.xlu2 %804 }
 0xb84   :  { %1329 = vmatmul.msk.f32.gmra.mxu2 %vm106_vm0, %v805_v44  ;;  %1331 = vmatmul.msk.f32.gmra.mxu3 %vm106_vm0, %v805_v44 }
 0xbff   :  { %v827_v46 = vpop.f32.mrf.mxu2  ;;  %v849_v47 = vpop.f32.mrf.mxu3 }
 0xc00   :  { %v854_v48 = vadd.f32 %v827_v46, %v797_v45 }
 0xc02   :  { %1443 = vtanh.f32 %v854_v48  ;;  %v1332_v57 = vmul.f32 -1.442695, %v854_v48 }
 0xc07   :  { %v830_v50 = vpop.f32.mrf.mxu2  ;;  %v851_v51 = vpop.f32.mrf.mxu3 }
 0xc08   :  { %v1444_v52 = vpop.eup %1443  ;;  %v855_v53 = vadd.f32 %v851_v51, %v799_v49 }
 0xc09   :  { %878 = vrot.lane.b32.xlu0 %v1444_v52, %s1654_s22 }
 0xc0a   :  { %1445 = vtanh.f32 %v855_v53  ;;  %v1333_v58 = vmul.f32 -1.442695, %v855_v53 }
 0xc0b   :  { %1447 = vpow2.f32 %v1332_v57 }
 0xc0c   :  { %1449 = vpow2.f32 %v1333_v58 }
 0xc10   :  { %v1446_v54 = vpop.eup %1445 }
 0xc11   :  { %915 = vrot.lane.b32.xlu1 %v1446_v54, %s1654_s22  ;;  %v1448_v59 = vpop.eup %1447 }
 0xc12   :  { %v859_v62 = vadd.f32 1.0, %v1448_v59  ;;  %v1450_v63 = vpop.eup %1449 }
 0xc13   :  { %v896_v60 = vadd.f32 1.0, %v1450_v63 }
 0xc14   :  { %1451 = vrcp.f32 %v859_v62  ;;  %v871_v3 = vand.u32 2147483648, %v859_v62  ;;  %vm865_vm12 = vweird.f32 %v859_v62  ;;  %v869_v4 = vand.u32 2147483647, %v859_v62 }
 0xc15   :  { %1453 = vrcp.f32 %v896_v60  ;;  %v908_v14 = vand.u32 2147483648, %v896_v60  ;;  %vm902_vm1 = vweird.f32 %v896_v60  ;;  %v906_v15 = vand.u32 2147483647, %v896_v60 }
 0xc16   :  { %v872_v12 = vor.u32 1.1754944e-38, %v871_v3  ;;  %vm870_vm14 = vcmp.eq.f32.partialorder %v869_v4, 8.507059e+37 }
 0xc17   :  { %v909_v17 = vor.u32 1.1754944e-38, %v908_v14  ;;  %vm907_vm3 = vcmp.eq.f32.partialorder %v906_v15, 8.507059e+37 }
 0xc1a   :  { %v1452_v56 = vpop.eup %1451 }
 0xc1b   :  { %v861_v0 = vmul.f32 %v1452_v56, %v859_v62  ;;  %v1454_v55 = vpop.eup %1453  ;;  %vm866_vm11 = vweird.f32 %v1452_v56 }
 0xc1c   :  { %v898_v10 = vmul.f32 %v1454_v55, %v896_v60  ;;  %vm867_vm13 = vmor %vm865_vm12, %vm866_vm11  ;;  %vm903_vm15 = vweird.f32 %v1454_v55 }
 0xc1d   :  { %v862_v8 = vsub.f32 1.0, %v861_v0  ;;  %vm904_vm2 = vmor %vm902_vm1, %vm903_vm15 }
 0xc1e   :  { %v899_v61 = vsub.f32 1.0, %v898_v10 }
 0xc1f   :  { %v863_v1 = vmul.f32 %v1452_v56, %v862_v8 }
 0xc20   :  { %v900_v5 = vmul.f32 %v1454_v55, %v899_v61 }
 0xc21   :  { %v864_v2 = vadd.f32 %v1452_v56, %v863_v1 }
 0xc22   :  { %v901_v13 = vadd.f32 %v1454_v55, %v900_v5 }
 0xc23   :  { %v868_v11 = vsel %vm867_vm13, %v1452_v56, %v864_v2 }
 0xc24   :  { %v873_v7 = vsel %vm870_vm14, %v872_v12, %v868_v11  ;;  %v905_v16 = vsel %vm904_vm2, %v1454_v55, %v901_v13 }
 0xc25   :  { %v910_v19 = vsel %vm907_vm3, %v909_v17, %v905_v16  ;;  %v876_v21 = vmul.f32 %v873_v7, %v1892_v33 }
 0xc26   :  { %v913_v25 = vmul.f32 %v910_v19, %v1896_v37 }
 0xc7b   :  { %v879_v6 = vpop.permute.xlu0 %878 }
 0xc7c   :  { %v881_v9 = vmul.f32 %v879_v6, %v873_v7 }
 0xc7e   :  { %883 = vrot.lane.b32.xlu2 %v881_v9, %s1653_s4 }
 0xc83   :  { %v916_v18 = vpop.permute.xlu1 %915 }
 0xc84   :  { %v918_v20 = vmul.f32 %v916_v18, %v910_v19 }
 0xc86   :  { %920 = vrot.lane.b32.xlu0 %v918_v20, %s1653_s4 }
 0xcd8   :  { %v884_v22 = vpop.permute.xlu2 %883 }
 0xcd9   :  { %v1912_v23 = vadd.f32 %v884_v22, %v876_v21 }
 0xcdb   :  { %1455 = vtanh.f32 %v1912_v23 }
 0xce1   :  { %v1456_v24 = vpop.eup %1455 }
 0xce2   :  { %889 = vrot.lane.b32.xlu1 %v1456_v24, %s1654_s22 }
 0xcf8   :  { %v921_v26 = vpop.permute.xlu0 %920 }
 0xcf9   :  { %v1917_v27 = vadd.f32 %v921_v26, %v913_v25  ;;  %v1065_v25 = vld [vmem:[#allocation6 + $0x38] sm:$0xff] }
 0xcfb   :  { %1457 = vtanh.f32 %v1917_v27 }
 0xd01   :  { %v1458_v28 = vpop.eup %1457 }
 0xd02   :  { %926 = vrot.lane.b32.xlu2 %v1458_v28, %s1654_s22 }
 0xd54   :  { %v890_v29 = vpop.permute.xlu1 %889 }
 0xd55   :  { %v892_v30 = vmul.f32 %v890_v29, %v873_v7 }
 0xd57   :  { %936 = vrot.lane.b32.xlu0 %v892_v30, %s1653_s4  ;;  %v1067_v30 = vld [vmem:[#allocation9 + $0x38] sm:$0xff] }
 0xd5c   :  { %v927_v31 = vpop.permute.xlu2 %926 }
 0xd5d   :  { %v929_v32 = vmul.f32 %v927_v31, %v910_v19 }
 0xd5f   :  { %938 = vrot.lane.b32.xlu1 %v929_v32, %s1653_s4 }
 0xdc9   :  { %v937_v33 = vpop.permute.xlu0 %936 }
 0xdca   :  { %1334 = vmatmul.msk.f32.vlgmr.msrb.gmra.mxu0 %vm106_vm0, %v937_v33  ;;  %1336 = vmatmul.msk.f32.vlgmr.msrb.gmra.mxu1 %vm106_vm0, %v937_v33 }
 0xdd1   :  { %v939_v34 = vpop.permute.xlu1 %938 }
 0xdd2   :  { %1335 = vmatmul.msk.f32.gmra.mxu0 %vm106_vm0, %v939_v34  ;;  %1337 = vmatmul.msk.f32.gmra.mxu1 %vm106_vm0, %v939_v34 }
 0xe47   :  { %v961_v36 = vpop.f32.mrf.mxu0  ;;  %v983_v37 = vpop.f32.mrf.mxu1 }
 0xe48   :  { %v988_v38 = vadd.f32 %v961_v36, %v931_v35 }
 0xe4a   :  { %1459 = vtanh.f32 %v988_v38  ;;  %v1338_v45 = vmul.f32 -1.442695, %v988_v38 }
 0xe4f   :  { %v964_v40 = vpop.f32.mrf.mxu0  ;;  %v985_v41 = vpop.f32.mrf.mxu1 }
 0xe50   :  { %v1460_v42 = vpop.eup %1459  ;;  %v989_v43 = vadd.f32 %v985_v41, %v933_v39 }
 0xe51   :  { %1012 = vrot.lane.b32.xlu2 %v1460_v42, %s1654_s22 }
 0xe52   :  { %1461 = vtanh.f32 %v989_v43  ;;  %v1339_v51 = vmul.f32 -1.442695, %v989_v43 }
 0xe53   :  { %1463 = vpow2.f32 %v1338_v45 }
 0xe58   :  { %v1462_v44 = vpop.eup %1461 }
 0xe59   :  { %1049 = vrot.lane.b32.xlu0 %v1462_v44, %s1654_s22  ;;  %v1464_v46 = vpop.eup %1463 }
 0xe5a   :  { %v993_v47 = vadd.f32 1.0, %v1464_v46 }
 0xe5c   :  { %1465 = vrcp.f32 %v993_v47  ;;  %v1005_v54 = vand.u32 2147483648, %v993_v47  ;;  %vm999_vm5 = vweird.f32 %v993_v47  ;;  %v1003_v57 = vand.u32 2147483647, %v993_v47 }
 0xe5d   :  { %1467 = vpow2.f32 %v1339_v51 }
 0xe5e   :  { %v1006_v62 = vor.u32 1.1754944e-38, %v1005_v54  ;;  %vm1004_vm7 = vcmp.eq.f32.partialorder %v1003_v57, 8.507059e+37 }
 0xe62   :  { %v1466_v48 = vpop.eup %1465 }
 0xe63   :  { %v995_v49 = vmul.f32 %v1466_v48, %v993_v47  ;;  %vm1000_vm4 = vweird.f32 %v1466_v48  ;;  %v1468_v58 = vpop.eup %1467 }
 0xe64   :  { %vm1001_vm6 = vmor %vm999_vm5, %vm1000_vm4  ;;  %v1030_v63 = vadd.f32 1.0, %v1468_v58 }
 0xe65   :  { %v996_v50 = vsub.f32 1.0, %v995_v49 }
 0xe66   :  { %1469 = vrcp.f32 %v1030_v63  ;;  %v1042_v61 = vand.u32 2147483648, %v1030_v63  ;;  %vm1036_vm9 = vweird.f32 %v1030_v63  ;;  %v1040_v3 = vand.u32 2147483647, %v1030_v63 }
 0xe67   :  { %v997_v52 = vmul.f32 %v1466_v48, %v996_v50 }
 0xe68   :  { %v1043_v11 = vor.u32 1.1754944e-38, %v1042_v61  ;;  %vm1041_vm11 = vcmp.eq.f32.partialorder %v1040_v3, 8.507059e+37 }
 0xe69   :  { %v998_v53 = vadd.f32 %v1466_v48, %v997_v52 }
 0xe6b   :  { %v1002_v59 = vsel %vm1001_vm6, %v1466_v48, %v998_v53 }
 0xe6c   :  { %v1007_v56 = vsel %vm1004_vm7, %v1006_v62, %v1002_v59  ;;  %v1470_v8 = vpop.eup %1469 }
 0xe6d   :  { %v1032_v55 = vmul.f32 %v1470_v8, %v1030_v63  ;;  %vm1037_vm8 = vweird.f32 %v1470_v8  ;;  %v1010_v7 = vmul.f32 %v1007_v56, %v1912_v23 }
 0xe6e   :  { %vm1038_vm10 = vmor %vm1036_vm9, %vm1037_vm8 }
 0xe6f   :  { %v1033_v1 = vsub.f32 1.0, %v1032_v55 }
 0xe71   :  { %v1034_v10 = vmul.f32 %v1470_v8, %v1033_v1 }
 0xe73   :  { %v1035_v2 = vadd.f32 %v1470_v8, %v1034_v10 }
 0xe75   :  { %v1039_v4 = vsel %vm1038_vm10, %v1470_v8, %v1035_v2 }
 0xe76   :  { %v1044_v12 = vsel %vm1041_vm11, %v1043_v11, %v1039_v4 }
 0xe77   :  { %v1047_v14 = vmul.f32 %v1044_v12, %v1917_v27 }
 0xeab   :  { %v1013_v60 = vpop.permute.xlu2 %1012 }
 0xeac   :  { %v1015_v0 = vmul.f32 %v1013_v60, %v1007_v56 }
 0xeae   :  { %1017 = vrot.lane.b32.xlu1 %v1015_v0, %s1653_s4 }
 0xecb   :  { %v1050_v5 = vpop.permute.xlu0 %1049 }
 0xecc   :  { %v1052_v6 = vmul.f32 %v1050_v5, %v1044_v12 }
 0xece   :  { %1054 = vrot.lane.b32.xlu2 %v1052_v6, %s1653_s4 }
 0xf20   :  { %v1018_v9 = vpop.permute.xlu1 %1017 }
 0xf21   :  { %v1932_v13 = vadd.f32 %v1018_v9, %v1010_v7  ;;  %v1228_v7 = vld [vmem:[#allocation14 + $0x18] sm:$0xff] }
 0xf22   :  { %v1224_v9 = vld [vmem:[#allocation12 + $0x18] sm:$0xff]  ;;  %1243 = vmatpush.msra.mxu0 %v1228_v7 }
 0xf23   :  { %1471 = vtanh.f32 %v1932_v13  ;;  %1265 = vmatpush.msra.mxu1 %v1224_v9 }
 0xf28   :  { %v1055_v15 = vpop.permute.xlu2 %1054 }
 0xf29   :  { %v1472_v16 = vpop.eup %1471  ;;  %v1936_v17 = vadd.f32 %v1055_v15, %v1047_v14  ;;  %v1227_v14 = vld [vmem:[#allocation14 + $0x10] sm:$0xff]  ;;  %v1222_v15 = vld [vmem:[#allocation12 + $0x8] sm:$0xff] }
 0xf2a   :  { %1023 = vrot.lane.b32.xlu0 %v1472_v16, %s1654_s22  ;;  %1244 = vmatpush.msra.mxu0 %v1227_v14  ;;  %v1221_v16 = vld [vmem:[#allocation12] sm:$0xff] }
 0xf2b   :  { %1473 = vtanh.f32 %v1936_v17 }
 0xf31   :  { %v1474_v18 = vpop.eup %1473 }
 0xf32   :  { %1060 = vrot.lane.b32.xlu1 %v1474_v18, %s1654_s22 }
 0xf9c   :  { %v1024_v19 = vpop.permute.xlu0 %1023 }
 0xf9d   :  { %v1026_v20 = vmul.f32 %v1024_v19, %v1007_v56 }
 0xf9f   :  { %1070 = vrot.lane.b32.xlu2 %v1026_v20, %s1653_s4  ;;  %v1226_v20 = vld [vmem:[#allocation14 + $0x8] sm:$0xff] }
 0xfa0   :  { %1245 = vmatpush.msra.mxu0 %v1226_v20 }
 0xfa4   :  { %v1061_v21 = vpop.permute.xlu1 %1060 }
 0xfa5   :  { %v1063_v22 = vmul.f32 %v1061_v21, %v1044_v12  ;;  %v1225_v21 = vld [vmem:[#allocation14] sm:$0xff] }
 0xfa6   :  { %1246 = vmatpush.msra.mxu0 %v1225_v21 }
 0xfa7   :  { %1072 = vrot.lane.b32.xlu0 %v1063_v22, %s1653_s4 }
 0xff9   :  { %v1071_v23 = vpop.permute.xlu2 %1070 }
 0xffa   :  { %1340 = vmatmul.msk.f32.vlgmr.msrb.gmra.mxu2 %vm106_vm0, %v1071_v23  ;;  %1342 = vmatmul.msk.f32.vlgmr.msrb.gmra.mxu3 %vm106_vm0, %v1071_v23 }
0x1019   :  { %v1073_v24 = vpop.permute.xlu0 %1072 }
0x101a   :  { %1341 = vmatmul.msk.f32.gmra.mxu2 %vm106_vm0, %v1073_v24  ;;  %1343 = vmatmul.msk.f32.gmra.mxu3 %vm106_vm0, %v1073_v24 }
0x107d   :  { %v1095_v26 = vpop.f32.mrf.mxu2  ;;  %v1117_v27 = vpop.f32.mrf.mxu3 }
0x107e   :  { %v1122_v28 = vadd.f32 %v1095_v26, %v1065_v25  ;;  %v1362_v25 = vld [vmem:[%s1974_s5] ss:$0 sm:$0xff] }
0x1080   :  { %1475 = vtanh.f32 %v1122_v28  ;;  %v1344_v35 = vmul.f32 -1.442695, %v1122_v28 }
0x1086   :  { %v1476_v29 = vpop.eup %1475 }
0x1087   :  { %1146 = vrot.lane.b32.xlu1 %v1476_v29, %s1654_s22 }
0x109d   :  { %v1098_v31 = vpop.f32.mrf.mxu2  ;;  %v1119_v32 = vpop.f32.mrf.mxu3 }
0x109e   :  { %v1123_v33 = vadd.f32 %v1119_v32, %v1067_v30 }
0x10a0   :  { %1477 = vtanh.f32 %v1123_v33  ;;  %v1345_v36 = vmul.f32 -1.442695, %v1123_v33 }
0x10a1   :  { %1479 = vpow2.f32 %v1344_v35 }
0x10a2   :  { %1481 = vpow2.f32 %v1345_v36 }
0x10a6   :  { %v1478_v34 = vpop.eup %1477 }
0x10a7   :  { %1183 = vrot.lane.b32.xlu2 %v1478_v34, %s1654_s22  ;;  %v1480_v37 = vpop.eup %1479 }
0x10a8   :  { %v1127_v38 = vadd.f32 1.0, %v1480_v37  ;;  %v1482_v39 = vpop.eup %1481 }
0x10a9   :  { %v1164_v40 = vadd.f32 1.0, %v1482_v39 }
0x10aa   :  { %1483 = vrcp.f32 %v1127_v38  ;;  %v1139_v49 = vand.u32 2147483648, %v1127_v38  ;;  %vm1133_vm13 = vweird.f32 %v1127_v38  ;;  %v1137_v50 = vand.u32 2147483647, %v1127_v38 }
0x10ab   :  { %1485 = vrcp.f32 %v1164_v40  ;;  %v1176_v62 = vand.u32 2147483648, %v1164_v40  ;;  %vm1170_vm2 = vweird.f32 %v1164_v40  ;;  %v1174_v63 = vand.u32 2147483647, %v1164_v40 }
0x10ac   :  { %v1140_v53 = vor.u32 1.1754944e-38, %v1139_v49  ;;  %vm1138_vm15 = vcmp.eq.f32.partialorder %v1137_v50, 8.507059e+37 }
0x10ad   :  { %v1177_v56 = vor.u32 1.1754944e-38, %v1176_v62  ;;  %vm1175_vm4 = vcmp.eq.f32.partialorder %v1174_v63, 8.507059e+37 }
0x10b0   :  { %v1484_v41 = vpop.eup %1483 }
0x10b1   :  { %v1129_v42 = vmul.f32 %v1484_v41, %v1127_v38  ;;  %v1486_v44 = vpop.eup %1485  ;;  %vm1134_vm12 = vweird.f32 %v1484_v41 }
0x10b2   :  { %v1166_v46 = vmul.f32 %v1486_v44, %v1164_v40  ;;  %vm1135_vm14 = vmor %vm1133_vm13, %vm1134_vm12  ;;  %vm1171_vm1 = vweird.f32 %v1486_v44 }
0x10b3   :  { %v1130_v43 = vsub.f32 1.0, %v1129_v42  ;;  %vm1172_vm3 = vmor %vm1170_vm2, %vm1171_vm1 }
0x10b4   :  { %v1167_v48 = vsub.f32 1.0, %v1166_v46 }
0x10b5   :  { %v1131_v45 = vmul.f32 %v1484_v41, %v1130_v43 }
0x10b6   :  { %v1168_v52 = vmul.f32 %v1486_v44, %v1167_v48 }
0x10b7   :  { %v1132_v47 = vadd.f32 %v1484_v41, %v1131_v45 }
0x10b8   :  { %v1169_v59 = vadd.f32 %v1486_v44, %v1168_v52 }
0x10b9   :  { %v1136_v51 = vsel %vm1135_vm14, %v1484_v41, %v1132_v47 }
0x10ba   :  { %v1141_v57 = vsel %vm1138_vm15, %v1140_v53, %v1136_v51  ;;  %v1173_v60 = vsel %vm1172_vm3, %v1486_v44, %v1169_v59 }
0x10bb   :  { %v1178_v8 = vsel %vm1175_vm4, %v1177_v56, %v1173_v60  ;;  %v1144_v1 = vmul.f32 %v1141_v57, %v1932_v13  ;;  %v1223_v13 = vld [vmem:[#allocation12 + $0x10] sm:$0xff] }
0x10bc   :  { %v1181_v61 = vmul.f32 %v1178_v8, %v1936_v17  ;;  %1266 = vmatpush.msra.mxu1 %v1223_v13 }
0x10be   :  { %1267 = vmatpush.msra.mxu1 %v1222_v15 }
0x10c0   :  { %1268 = vmatpush.msra.mxu1 %v1221_v16 }
0x10f9   :  { %v1147_v54 = vpop.permute.xlu1 %1146 }
0x10fa   :  { %v1149_v58 = vmul.f32 %v1147_v54, %v1141_v57 }
0x10fc   :  { %1151 = vrot.lane.b32.xlu0 %v1149_v58, %s1653_s4 }
0x1101   :  { %v1184_v0 = vpop.permute.xlu2 %1183 }
0x1102   :  { %v1186_v55 = vmul.f32 %v1184_v0, %v1178_v8 }
0x1104   :  { %1188 = vrot.lane.b32.xlu1 %v1186_v55, %s1653_s4 }
0x116e   :  { %v1152_v10 = vpop.permute.xlu0 %1151 }
0x116f   :  { %v1154_v2 = vadd.f32 %v1152_v10, %v1144_v1 }
0x1171   :  { %1487 = vtanh.f32 %v1154_v2 }
0x1176   :  { %v1189_v3 = vpop.permute.xlu1 %1188 }
0x1177   :  { %v1488_v4 = vpop.eup %1487  ;;  %v1191_v11 = vadd.f32 %v1189_v3, %v1181_v61 }
0x1178   :  { %1157 = vrot.lane.b32.xlu2 %v1488_v4, %s1654_s22 }
0x1179   :  { %1489 = vtanh.f32 %v1191_v11 }
0x117f   :  { %v1490_v5 = vpop.eup %1489 }
0x1180   :  { %1194 = vrot.lane.b32.xlu0 %v1490_v5, %s1654_s22 }
0x1188   :  { %1204 = vrot.lane.b32.xlu0 %v1154_v2, %s1655_s23 }
0x11d2   :  { %v1158_v12 = vpop.permute.xlu2 %1157 }
0x11d3   :  { %v1160_v6 = vmul.f32 %v1158_v12, %v1141_v57 }
0x11d5   :  { %1199 = vrot.lane.b32.xlu1 %v1160_v6, %s1653_s4 }
0x11dd   :  { %1214 = vrot.lane.b32.xlu1 %v1191_v11, %s1655_s23 }
0x11f2   :  { %v1195_v17 = vpop.permute.xlu0 %1194 }
0x11f3   :  { %v1197_v18 = vmul.f32 %v1195_v17, %v1178_v8 }
0x11f5   :  { %1209 = vrot.lane.b32.xlu2 %v1197_v18, %s1653_s4 }
0x11fa   :  { %v1205_v19 = vpop.permute.xlu0 %1204 }
0x11fb   :  { %1207 = vst.msk [vmem:[#allocation3] sm:$0xff] %vm106_vm0, %v1205_v19 }
0x1247   :  { %v1200_v22 = vpop.permute.xlu1 %1199 }
0x1248   :  { %1202 = vst.msk [vmem:[#allocation2] sm:$0xff] %vm106_vm0, %v1200_v22  ;;  %1347 = vmatmul.msk.f32.vlgmr.msra.gmra.mxu1 %vm106_vm0, %v1200_v22 }
0x124f   :  { %v1215_v23 = vpop.permute.xlu1 %1214  ;;  %v1210_v24 = vpop.permute.xlu2 %1209 }
0x1250   :  { %1217 = vst.msk [vmem:[#allocation5] sm:$0xff] %vm106_vm0, %v1215_v23  ;;  %1346 = vmatmul.msk.f32.vlgmr.msra.gmra.mxu0 %vm106_vm0, %v1210_v24 }
0x1251   :  { %1212 = vst.msk [vmem:[#allocation4] sm:$0xff] %vm106_vm0, %v1210_v24 }
0x12c5   :  { %v1270_v26 = vpop.f32.mrf.mxu1 }
0x12cd   :  { %v1248_v27 = vpop.f32.mrf.mxu0 }
0x12ce   :  { %v1271_v28 = vadd.f32 %v1270_v26, %v1248_v27 }
0x12d0   :  { %v1277_v29 = vadd.f32 %v1362_v25, %v1271_v28 }
0x12d2   :  { %1278 = vst [vmem:[#allocation15] sm:$0xff] %v1277_v29 }
0x12d3   :  { %1289 = dma.vmem_to_hbm [thread:$0]  %s1285_s27, 128, %s1287_s30, [#allocation8]  }
0x12d4   :  { %1641 = dma.done.wait [#allocation8], 128  }
0x12d5   :  { %1642 = vsyncadd [#allocation8], 4294967168 }
0x12d6   :  { %1294 = vsyncpa [#allocation7], 1 }
0x12d7   :  { %1295 = vsyncpa [#allocation10], 1 }
0x12d8   :  { %1296 = vsyncpa [#allocation13], 1 }
0x12d9   :  { %1297 = vsyncpa [#allocation8], 1 }

</bundles_post_ra>
